<compile_context>
chip_gen: v7x
topology: tpu7x:2x2x1
jax: 0.10.0
libtpu: 0.0.40
codegen_flags: <defaults>
</compile_context>

<pallas_src>
import functools

import jax
import jax.numpy as jnp
from jax import lax
from jax.experimental import pallas as pl
from jax.experimental.pallas import tpu as pltpu


def self_attention_kernel(x_ref, wqkv_ref, wu_ref, bu_ref, mask_ref, o_ref, *,
                          heads, hidden, b_tile, n):
    """One batch tile (b_tile sequences) of multi-head causal self-attention."""
    hh = heads * hidden
    emb = x_ref.shape[-1]

    x = x_ref[...]              # (b_tile*n, emb)  bf16
    wqkv = wqkv_ref[...]        # (emb, 3*hh)      bf16
    wu = wu_ref[...]            # (hh, emb)        bf16
    bias = bu_ref[...]          # (1, emb)         f32
    mask_bias = mask_ref[...]   # (n, n)           f32, 0 / -1e30

    # Fused Q/K/V projection over the whole batch tile: one lane-dense MXU
    # matmul with M = b_tile*n rows, f32 accumulation.
    qkv = jnp.dot(x, wqkv, preferred_element_type=jnp.float32)   # (b_tile*n, 3*hh)

    # (q / sqrt(hidden)) . (k / sqrt(hidden))  ==  (q . k) * (1 / hidden)
    inv_hidden = 1.0 / float(hidden)

    batch_rows = []
    # b_tile and heads are tiny and static -> Python unrolling gives static
    # (sublane/lane) slice offsets.
    # TODO(synk): for large heads / b_tile switch to lax.fori_loop carries so
    # live ranges are bounded explicitly.
    for b in range(b_tile):
        rsl = slice(b * n, (b + 1) * n)
        acc = jnp.zeros((n, emb), jnp.float32)
        for h in range(heads):
            q_h = qkv[rsl, h * hidden:(h + 1) * hidden].astype(jnp.bfloat16)
            k_h = qkv[rsl, hh + h * hidden:hh + (h + 1) * hidden].astype(jnp.bfloat16)
            v_h = qkv[rsl, 2 * hh + h * hidden:2 * hh + (h + 1) * hidden].astype(jnp.bfloat16)

            # QK^T without materializing k.T (contract last dims on the MXU).
            logits = lax.dot_general(q_h, k_h, (((1,), (1,)), ((), ())),
                                     preferred_element_type=jnp.float32)    # (n, n)
            logits = logits * inv_hidden + mask_bias

            # Softmax over keys in f32 (diagonal never masked -> row max finite).
            m = jnp.max(logits, axis=-1, keepdims=True)
            p = jnp.exp(logits - m)
            denom = jnp.sum(p, axis=-1, keepdims=True)
            inv_denom = pl.reciprocal(denom, approx=True)   # EUP, not a VALU divide

            pv = jnp.dot(p.astype(jnp.bfloat16), v_h,
                         preferred_element_type=jnp.float32)                 # (n, hidden)
            pv = (pv * inv_denom).astype(jnp.bfloat16)       # fold 1/denom into small tensor

            # unifyheads as per-head accumulation through a sublane-aligned
            # row-slice of Wu (no lane-unaligned concat of head outputs).
            acc = acc + jnp.dot(pv, wu[h * hidden:(h + 1) * hidden, :],
                                preferred_element_type=jnp.float32)          # (n, emb)
        batch_rows.append(acc + bias)

    out = batch_rows[0] if b_tile == 1 else jnp.concatenate(batch_rows, axis=0)
    # dropout_att = 0.0 in the module defaults -> identity.
    # TODO(synk): when emb < 128 lanes, present a (b_tile, n*emb) lane-dense
    # output block (single unmasked vst, biggest lever on v5e) instead of this
    # (b_tile*n, emb) block; skipped because the in-kernel (n,emb)->(n*emb,)
    # lane repack is not guaranteed to lower on every jax version.
    o_ref[...] = out.astype(o_ref.dtype)


def self_attention_pallas(x, w_q, w_k, w_v, w_u, b_u, *, heads, hidden,
                          batch_tile=None, compute_dtype=jnp.bfloat16,
                          out_dtype=jnp.float32,
                          vmem_limit_bytes=64 * 1024 * 1024,
                          single_buffer_weights=True):
    """x: (bs, n, emb) float32.

    w_q/w_k/w_v: (heads*hidden, emb)  -- PyTorch nn.Linear weight layout (out, in)
    w_u:         (emb, heads*hidden)  -- PyTorch nn.Linear weight layout (out, in)
    b_u:         (emb,)
    """
    bs, n, emb = x.shape
    hh = heads * hidden

    if batch_tile is None:
        batch_tile = bs        # all rows in one grid step at small bs
                               # (use bs // 2 per step on v7x so both TCs get work)
    assert bs % batch_tile == 0, "batch_tile must divide batch size"
    num_tiles = bs // batch_tile
    rows = batch_tile * n

    # Host-side weight prep (glue, not hot path).
    # y = x @ W.T with columns ordered (head, hidden); fuse Q|K|V along columns.
    wqkv = jnp.concatenate([w_q.T, w_k.T, w_v.T], axis=1).astype(compute_dtype)  # (emb, 3*hh)
    wu_t = w_u.T.astype(compute_dtype)                                            # (hh, emb)
    bu2 = b_u.reshape(1, emb).astype(jnp.float32)                                 # bias stays f32
    x2 = x.reshape(bs * n, emb).astype(compute_dtype)

    # Causal-mask additive bias as a tiny resident constant input.
    # parrallel_recomb(arange(1,n+1), arange(1,n+1), 'all') == (key <= query).
    row_i = jnp.arange(n)[:, None]
    col_i = jnp.arange(n)[None, :]
    mask_bias = jnp.where(col_i <= row_i, 0.0, -1e30).astype(jnp.float32)

    # Constant-index (resident) inputs: single-buffer them when supported.
    def const_spec(shape):
        idx = lambda t: (0,) * len(shape)
        if single_buffer_weights and hasattr(pl, "Buffered"):
            try:
                return pl.BlockSpec(shape, idx, pipeline_mode=pl.Buffered(1))
            except TypeError:
                pass
        return pl.BlockSpec(shape, idx)

    kernel = functools.partial(self_attention_kernel, heads=heads, hidden=hidden,
                               b_tile=batch_tile, n=n)

    flops = (2 * bs * n * emb * 3 * hh            # fused QKV projection
             + 4 * bs * heads * n * n * hidden    # QK^T + PV
             + 2 * bs * n * hh * emb)             # unifyheads accumulation
    bytes_accessed = (x2.nbytes + wqkv.nbytes + wu_t.nbytes + bu2.nbytes
                      + mask_bias.nbytes + bs * n * emb * jnp.dtype(out_dtype).itemsize)
    cost = pl.CostEstimate(flops=flops, transcendentals=bs * heads * n * n,
                           bytes_accessed=bytes_accessed)

    out2 = pl.pallas_call(
        kernel,
        out_shape=jax.ShapeDtypeStruct((bs * n, emb), out_dtype),
        grid_spec=pltpu.PrefetchScalarGridSpec(
            num_scalar_prefetch=0,
            grid=(num_tiles,),                                  # batch tiles
            in_specs=[
                pl.BlockSpec((rows, emb), lambda t: (t, 0)),    # x   (per batch tile)
                const_spec((emb, 3 * hh)),                      # Wqkv (resident)
                const_spec((hh, emb)),                          # Wu   (resident)
                const_spec((1, emb)),                           # bias (resident)
                const_spec((n, n)),                             # causal mask (resident)
            ],
            out_specs=pl.BlockSpec((rows, emb), lambda t: (t, 0)),
        ),
        compiler_params=pltpu.CompilerParams(
            dimension_semantics=("parallel",),     # batch tiles across cores
            vmem_limit_bytes=vmem_limit_bytes,     # raise toward ~100 MiB on v6e/v5e,
                                                   # keep <= 32 MiB on v7x
        ),
        cost_estimate=cost,
    )(x2, wqkv, wu_t, bu2, mask_bias)

    return out2.reshape(bs, n, emb)


def self_attention_reference(x, w_q, w_k, w_v, w_u, b_u, *, heads, hidden):
    """Pure-JAX f32 reference mirroring the PyTorch forward exactly."""
    bs, n, emb = x.shape
    h = heads

    def proj(w):
        y = x @ w.T                                # (bs, n, h*hidden)
        y = y.reshape(bs, n, h, hidden)
        y = jnp.transpose(y, (0, 2, 1, 3))         # (bs, h, n, hidden)
        return y.reshape(bs * h, n, hidden)

    keys = proj(w_k)
    queries = proj(w_q)
    values = proj(w_v)

    scale = hidden ** 0.5
    queries = queries / scale
    keys = keys / scale
    dot = jnp.einsum('bqd,bkd->bqk', queries, keys)     # (bs*h, n, n)

    row = jnp.arange(n)[:, None]
    col = jnp.arange(n)[None, :]
    causal = col <= row
    dot = jnp.where(causal[None], dot, -jnp.inf)
    att = jax.nn.softmax(dot, axis=2)

    out = jnp.einsum('bqk,bkd->bqd', att, values)       # (bs*h, n, hidden)
    out = out.reshape(bs, h, n, hidden)
    out = jnp.transpose(out, (0, 2, 1, 3)).reshape(bs, n, h * hidden)
    return out @ w_u.T + b_u


if __name__ == "__main__":
    # Small shapes consistent with the module: (batch, seq, emb)
    bs, n, emb = 2, 8, 32
    heads, hidden = 4, 16

    key = jax.random.PRNGKey(0)
    k_x, k_q, k_k, k_v, k_u, k_b = jax.random.split(key, 6)

    x = jax.random.normal(k_x, (bs, n, emb), dtype=jnp.float32)

    # Deterministic synthetic parameters in PyTorch nn.Linear (out, in) layout.
    w_q = jax.random.normal(k_q, (heads * hidden, emb), dtype=jnp.float32) * 0.1
    w_k = jax.random.normal(k_k, (heads * hidden, emb), dtype=jnp.float32) * 0.1
    w_v = jax.random.normal(k_v, (heads * hidden, emb), dtype=jnp.float32) * 0.1
    w_u = jax.random.normal(k_u, (emb, heads * hidden), dtype=jnp.float32) * 0.1
    b_u = jax.random.normal(k_b, (emb,), dtype=jnp.float32) * 0.1

    fn = jax.jit(functools.partial(self_attention_pallas, heads=heads, hidden=hidden))
    try:
        out = jax.block_until_ready(fn(x, w_q, w_k, w_v, w_u, b_u))
    except Exception:
        # Graceful degradation if pl.Buffered(1) single-buffering of the resident
        # weight specs is not supported by the installed jax: fall back to the
        # default double-buffered specs (identical math).
        fn = jax.jit(functools.partial(self_attention_pallas, heads=heads, hidden=hidden,
                                       single_buffer_weights=False))
        out = jax.block_until_ready(fn(x, w_q, w_k, w_v, w_u, b_u))

    ref = self_attention_reference(x, w_q, w_k, w_v, w_u, b_u, heads=heads, hidden=hidden)
    assert out.shape == (bs, n, emb)
    # bf16 matmul inputs with f32 accumulation -> compare at mixed-precision tolerance.
    assert jnp.allclose(out, ref, atol=3e-2, rtol=3e-2), "mismatch vs reference"

    print("KERNEL_OK")
</pallas_src>

<mosaic_0001>
module attributes {stable_mosaic.version = 11 : i64} {
  func.func @self_attention_kernel(%arg0: i32, %arg1: memref<16x32xbf16, #tpu.memory_space<vmem>>, %arg2: memref<32x192xbf16, #tpu.memory_space<vmem>>, %arg3: memref<64x32xbf16, #tpu.memory_space<vmem>>, %arg4: memref<1x32xf32, #tpu.memory_space<vmem>>, %arg5: memref<8x8xf32, #tpu.memory_space<vmem>>, %arg6: memref<16x32xf32, #tpu.memory_space<vmem>>) attributes {dimension_semantics = [#tpu.dimension_semantics<parallel>], iteration_bounds = array<i64: 1>, scalar_prefetch = 0 : i64, scratch_operands = 0 : i64, tpu.core_type = #tpu.core_type<tc>, window_params = [{transform_indices = @transform_0, window_bounds = array<i64: 16, 32>}, {pipeline_mode = #tpu.pipeline_mode<synchronous>, transform_indices = @transform_1, window_bounds = array<i64: 32, 192>}, {pipeline_mode = #tpu.pipeline_mode<synchronous>, transform_indices = @transform_2, window_bounds = array<i64: 64, 32>}, {pipeline_mode = #tpu.pipeline_mode<synchronous>, transform_indices = @transform_3, window_bounds = array<i64: 1, 32>}, {pipeline_mode = #tpu.pipeline_mode<synchronous>, transform_indices = @transform_4, window_bounds = array<i64: 8, 8>}, {transform_indices = @transform_5, window_bounds = array<i64: 16, 32>}]} {
    %c0 = arith.constant 0 : index
    %c0_0 = arith.constant 0 : index
    %0 = vector.load %arg1[%c0, %c0_0] : memref<16x32xbf16, #tpu.memory_space<vmem>>, vector<16x32xbf16>
    %c0_1 = arith.constant 0 : index
    %c0_2 = arith.constant 0 : index
    %1 = vector.load %arg2[%c0_1, %c0_2] : memref<32x192xbf16, #tpu.memory_space<vmem>>, vector<32x192xbf16>
    %c0_3 = arith.constant 0 : index
    %c0_4 = arith.constant 0 : index
    %2 = vector.load %arg3[%c0_3, %c0_4] : memref<64x32xbf16, #tpu.memory_space<vmem>>, vector<64x32xbf16>
    %c0_5 = arith.constant 0 : index
    %c0_6 = arith.constant 0 : index
    %3 = vector.load %arg4[%c0_5, %c0_6] : memref<1x32xf32, #tpu.memory_space<vmem>>, vector<1x32xf32>
    %c0_7 = arith.constant 0 : index
    %c0_8 = arith.constant 0 : index
    %4 = vector.load %arg5[%c0_7, %c0_8] : memref<8x8xf32, #tpu.memory_space<vmem>>, vector<8x8xf32>
    %cst = arith.constant dense<0.000000e+00> : vector<16x192xf32>
    %5 = tpu.matmul %0, %1, %cst {dimension_numbers = #tpu.dot_dimension_numbers<[1], [0], [0], [1], [0, 0, 1, 1], [], []>} : vector<16x32xbf16>, vector<32x192xbf16>, vector<16x192xf32> -> vector<16x192xf32>
    %cst_9 = arith.constant 0.000000e+00 : f32
    %6 = vector.broadcast %cst_9 : f32 to vector<8x32xf32>
    %7 = vector.extract_strided_slice %5 {offsets = [0, 0], sizes = [8, 16], strides = [1, 1]} : vector<16x192xf32> to vector<8x16xf32>
    %8 = arith.truncf %7 : vector<8x16xf32> to vector<8x16xbf16>
    %9 = vector.extract_strided_slice %5 {offsets = [0, 64], sizes = [8, 16], strides = [1, 1]} : vector<16x192xf32> to vector<8x16xf32>
    %10 = arith.truncf %9 : vector<8x16xf32> to vector<8x16xbf16>
    %11 = vector.extract_strided_slice %5 {offsets = [0, 128], sizes = [8, 16], strides = [1, 1]} : vector<16x192xf32> to vector<8x16xf32>
    %12 = arith.truncf %11 : vector<8x16xf32> to vector<8x16xbf16>
    %cst_10 = arith.constant dense<0.000000e+00> : vector<8x8xf32>
    %13 = tpu.matmul %8, %10, %cst_10 {dimension_numbers = #tpu.dot_dimension_numbers<[1], [1], [0], [0], [0, 0, 1, 0], [], []>} : vector<8x16xbf16>, vector<8x16xbf16>, vector<8x8xf32> -> vector<8x8xf32>
    %cst_11 = arith.constant 6.250000e-02 : f32
    %14 = vector.broadcast %cst_11 : f32 to vector<8x8xf32>
    %15 = arith.mulf %13, %14 : vector<8x8xf32>
    %16 = arith.addf %15, %4 : vector<8x8xf32>
    %cst_12 = arith.constant dense<0xFF800000> : vector<8xf32>
    %17 = vector.multi_reduction <maximumf>, %16, %cst_12 [1] : vector<8x8xf32> to vector<8xf32>
    %18 = vector.shape_cast %17 : vector<8xf32> to vector<8x1xf32>
    %19 = vector.broadcast %18 : vector<8x1xf32> to vector<8x8xf32>
    %20 = arith.subf %16, %19 : vector<8x8xf32>
    %21 = math.exp %20 : vector<8x8xf32>
    %cst_13 = arith.constant dense<0.000000e+00> : vector<8xf32>
    %22 = vector.multi_reduction <add>, %21, %cst_13 [1] : vector<8x8xf32> to vector<8xf32>
    %23 = vector.shape_cast %22 : vector<8xf32> to vector<8x1xf32>
    %24 = tpu.reciprocal %23 {approx = true} : vector<8x1xf32> -> vector<8x1xf32>
    %25 = arith.truncf %21 : vector<8x8xf32> to vector<8x8xbf16>
    %cst_14 = arith.constant dense<0.000000e+00> : vector<8x16xf32>
    %26 = tpu.matmul %25, %12, %cst_14 {dimension_numbers = #tpu.dot_dimension_numbers<[1], [0], [0], [1], [0, 0, 1, 1], [], []>} : vector<8x8xbf16>, vector<8x16xbf16>, vector<8x16xf32> -> vector<8x16xf32>
    %27 = vector.broadcast %24 : vector<8x1xf32> to vector<8x16xf32>
    %28 = arith.mulf %26, %27 : vector<8x16xf32>
    %29 = arith.truncf %28 : vector<8x16xf32> to vector<8x16xbf16>
    %30 = vector.extract_strided_slice %2 {offsets = [0, 0], sizes = [16, 32], strides = [1, 1]} : vector<64x32xbf16> to vector<16x32xbf16>
    %cst_15 = arith.constant dense<0.000000e+00> : vector<8x32xf32>
    %31 = tpu.matmul %29, %30, %cst_15 {dimension_numbers = #tpu.dot_dimension_numbers<[1], [0], [0], [1], [0, 0, 1, 1], [], []>} : vector<8x16xbf16>, vector<16x32xbf16>, vector<8x32xf32> -> vector<8x32xf32>
    %32 = arith.addf %6, %31 : vector<8x32xf32>
    %33 = vector.extract_strided_slice %5 {offsets = [0, 16], sizes = [8, 16], strides = [1, 1]} : vector<16x192xf32> to vector<8x16xf32>
    %34 = arith.truncf %33 : vector<8x16xf32> to vector<8x16xbf16>
    %35 = vector.extract_strided_slice %5 {offsets = [0, 80], sizes = [8, 16], strides = [1, 1]} : vector<16x192xf32> to vector<8x16xf32>
    %36 = arith.truncf %35 : vector<8x16xf32> to vector<8x16xbf16>
    %37 = vector.extract_strided_slice %5 {offsets = [0, 144], sizes = [8, 16], strides = [1, 1]} : vector<16x192xf32> to vector<8x16xf32>
    %38 = arith.truncf %37 : vector<8x16xf32> to vector<8x16xbf16>
    %cst_16 = arith.constant dense<0.000000e+00> : vector<8x8xf32>
    %39 = tpu.matmul %34, %36, %cst_16 {dimension_numbers = #tpu.dot_dimension_numbers<[1], [1], [0], [0], [0, 0, 1, 0], [], []>} : vector<8x16xbf16>, vector<8x16xbf16>, vector<8x8xf32> -> vector<8x8xf32>
    %cst_17 = arith.constant 6.250000e-02 : f32
    %40 = vector.broadcast %cst_17 : f32 to vector<8x8xf32>
    %41 = arith.mulf %39, %40 : vector<8x8xf32>
    %42 = arith.addf %41, %4 : vector<8x8xf32>
    %cst_18 = arith.constant dense<0xFF800000> : vector<8xf32>
    %43 = vector.multi_reduction <maximumf>, %42, %cst_18 [1] : vector<8x8xf32> to vector<8xf32>
    %44 = vector.shape_cast %43 : vector<8xf32> to vector<8x1xf32>
    %45 = vector.broadcast %44 : vector<8x1xf32> to vector<8x8xf32>
    %46 = arith.subf %42, %45 : vector<8x8xf32>
    %47 = math.exp %46 : vector<8x8xf32>
    %cst_19 = arith.constant dense<0.000000e+00> : vector<8xf32>
    %48 = vector.multi_reduction <add>, %47, %cst_19 [1] : vector<8x8xf32> to vector<8xf32>
    %49 = vector.shape_cast %48 : vector<8xf32> to vector<8x1xf32>
    %50 = tpu.reciprocal %49 {approx = true} : vector<8x1xf32> -> vector<8x1xf32>
    %51 = arith.truncf %47 : vector<8x8xf32> to vector<8x8xbf16>
    %cst_20 = arith.constant dense<0.000000e+00> : vector<8x16xf32>
    %52 = tpu.matmul %51, %38, %cst_20 {dimension_numbers = #tpu.dot_dimension_numbers<[1], [0], [0], [1], [0, 0, 1, 1], [], []>} : vector<8x8xbf16>, vector<8x16xbf16>, vector<8x16xf32> -> vector<8x16xf32>
    %53 = vector.broadcast %50 : vector<8x1xf32> to vector<8x16xf32>
    %54 = arith.mulf %52, %53 : vector<8x16xf32>
    %55 = arith.truncf %54 : vector<8x16xf32> to vector<8x16xbf16>
    %56 = vector.extract_strided_slice %2 {offsets = [16, 0], sizes = [16, 32], strides = [1, 1]} : vector<64x32xbf16> to vector<16x32xbf16>
    %cst_21 = arith.constant dense<0.000000e+00> : vector<8x32xf32>
    %57 = tpu.matmul %55, %56, %cst_21 {dimension_numbers = #tpu.dot_dimension_numbers<[1], [0], [0], [1], [0, 0, 1, 1], [], []>} : vector<8x16xbf16>, vector<16x32xbf16>, vector<8x32xf32> -> vector<8x32xf32>
    %58 = arith.addf %32, %57 : vector<8x32xf32>
    %59 = vector.extract_strided_slice %5 {offsets = [0, 32], sizes = [8, 16], strides = [1, 1]} : vector<16x192xf32> to vector<8x16xf32>
    %60 = arith.truncf %59 : vector<8x16xf32> to vector<8x16xbf16>
    %61 = vector.extract_strided_slice %5 {offsets = [0, 96], sizes = [8, 16], strides = [1, 1]} : vector<16x192xf32> to vector<8x16xf32>
    %62 = arith.truncf %61 : vector<8x16xf32> to vector<8x16xbf16>
    %63 = vector.extract_strided_slice %5 {offsets = [0, 160], sizes = [8, 16], strides = [1, 1]} : vector<16x192xf32> to vector<8x16xf32>
    %64 = arith.truncf %63 : vector<8x16xf32> to vector<8x16xbf16>
    %cst_22 = arith.constant dense<0.000000e+00> : vector<8x8xf32>
    %65 = tpu.matmul %60, %62, %cst_22 {dimension_numbers = #tpu.dot_dimension_numbers<[1], [1], [0], [0], [0, 0, 1, 0], [], []>} : vector<8x16xbf16>, vector<8x16xbf16>, vector<8x8xf32> -> vector<8x8xf32>
    %cst_23 = arith.constant 6.250000e-02 : f32
    %66 = vector.broadcast %cst_23 : f32 to vector<8x8xf32>
    %67 = arith.mulf %65, %66 : vector<8x8xf32>
    %68 = arith.addf %67, %4 : vector<8x8xf32>
    %cst_24 = arith.constant dense<0xFF800000> : vector<8xf32>
    %69 = vector.multi_reduction <maximumf>, %68, %cst_24 [1] : vector<8x8xf32> to vector<8xf32>
    %70 = vector.shape_cast %69 : vector<8xf32> to vector<8x1xf32>
    %71 = vector.broadcast %70 : vector<8x1xf32> to vector<8x8xf32>
    %72 = arith.subf %68, %71 : vector<8x8xf32>
    %73 = math.exp %72 : vector<8x8xf32>
    %cst_25 = arith.constant dense<0.000000e+00> : vector<8xf32>
    %74 = vector.multi_reduction <add>, %73, %cst_25 [1] : vector<8x8xf32> to vector<8xf32>
    %75 = vector.shape_cast %74 : vector<8xf32> to vector<8x1xf32>
    %76 = tpu.reciprocal %75 {approx = true} : vector<8x1xf32> -> vector<8x1xf32>
    %77 = arith.truncf %73 : vector<8x8xf32> to vector<8x8xbf16>
    %cst_26 = arith.constant dense<0.000000e+00> : vector<8x16xf32>
    %78 = tpu.matmul %77, %64, %cst_26 {dimension_numbers = #tpu.dot_dimension_numbers<[1], [0], [0], [1], [0, 0, 1, 1], [], []>} : vector<8x8xbf16>, vector<8x16xbf16>, vector<8x16xf32> -> vector<8x16xf32>
    %79 = vector.broadcast %76 : vector<8x1xf32> to vector<8x16xf32>
    %80 = arith.mulf %78, %79 : vector<8x16xf32>
    %81 = arith.truncf %80 : vector<8x16xf32> to vector<8x16xbf16>
    %82 = vector.extract_strided_slice %2 {offsets = [32, 0], sizes = [16, 32], strides = [1, 1]} : vector<64x32xbf16> to vector<16x32xbf16>
    %cst_27 = arith.constant dense<0.000000e+00> : vector<8x32xf32>
    %83 = tpu.matmul %81, %82, %cst_27 {dimension_numbers = #tpu.dot_dimension_numbers<[1], [0], [0], [1], [0, 0, 1, 1], [], []>} : vector<8x16xbf16>, vector<16x32xbf16>, vector<8x32xf32> -> vector<8x32xf32>
    %84 = arith.addf %58, %83 : vector<8x32xf32>
    %85 = vector.extract_strided_slice %5 {offsets = [0, 48], sizes = [8, 16], strides = [1, 1]} : vector<16x192xf32> to vector<8x16xf32>
    %86 = arith.truncf %85 : vector<8x16xf32> to vector<8x16xbf16>
    %87 = vector.extract_strided_slice %5 {offsets = [0, 112], sizes = [8, 16], strides = [1, 1]} : vector<16x192xf32> to vector<8x16xf32>
    %88 = arith.truncf %87 : vector<8x16xf32> to vector<8x16xbf16>
    %89 = vector.extract_strided_slice %5 {offsets = [0, 176], sizes = [8, 16], strides = [1, 1]} : vector<16x192xf32> to vector<8x16xf32>
    %90 = arith.truncf %89 : vector<8x16xf32> to vector<8x16xbf16>
    %cst_28 = arith.constant dense<0.000000e+00> : vector<8x8xf32>
    %91 = tpu.matmul %86, %88, %cst_28 {dimension_numbers = #tpu.dot_dimension_numbers<[1], [1], [0], [0], [0, 0, 1, 0], [], []>} : vector<8x16xbf16>, vector<8x16xbf16>, vector<8x8xf32> -> vector<8x8xf32>
    %cst_29 = arith.constant 6.250000e-02 : f32
    %92 = vector.broadcast %cst_29 : f32 to vector<8x8xf32>
    %93 = arith.mulf %91, %92 : vector<8x8xf32>
    %94 = arith.addf %93, %4 : vector<8x8xf32>
    %cst_30 = arith.constant dense<0xFF800000> : vector<8xf32>
    %95 = vector.multi_reduction <maximumf>, %94, %cst_30 [1] : vector<8x8xf32> to vector<8xf32>
    %96 = vector.shape_cast %95 : vector<8xf32> to vector<8x1xf32>
    %97 = vector.broadcast %96 : vector<8x1xf32> to vector<8x8xf32>
    %98 = arith.subf %94, %97 : vector<8x8xf32>
    %99 = math.exp %98 : vector<8x8xf32>
    %cst_31 = arith.constant dense<0.000000e+00> : vector<8xf32>
    %100 = vector.multi_reduction <add>, %99, %cst_31 [1] : vector<8x8xf32> to vector<8xf32>
    %101 = vector.shape_cast %100 : vector<8xf32> to vector<8x1xf32>
    %102 = tpu.reciprocal %101 {approx = true} : vector<8x1xf32> -> vector<8x1xf32>
    %103 = arith.truncf %99 : vector<8x8xf32> to vector<8x8xbf16>
    %cst_32 = arith.constant dense<0.000000e+00> : vector<8x16xf32>
    %104 = tpu.matmul %103, %90, %cst_32 {dimension_numbers = #tpu.dot_dimension_numbers<[1], [0], [0], [1], [0, 0, 1, 1], [], []>} : vector<8x8xbf16>, vector<8x16xbf16>, vector<8x16xf32> -> vector<8x16xf32>
    %105 = vector.broadcast %102 : vector<8x1xf32> to vector<8x16xf32>
    %106 = arith.mulf %104, %105 : vector<8x16xf32>
    %107 = arith.truncf %106 : vector<8x16xf32> to vector<8x16xbf16>
    %108 = vector.extract_strided_slice %2 {offsets = [48, 0], sizes = [16, 32], strides = [1, 1]} : vector<64x32xbf16> to vector<16x32xbf16>
    %cst_33 = arith.constant dense<0.000000e+00> : vector<8x32xf32>
    %109 = tpu.matmul %107, %108, %cst_33 {dimension_numbers = #tpu.dot_dimension_numbers<[1], [0], [0], [1], [0, 0, 1, 1], [], []>} : vector<8x16xbf16>, vector<16x32xbf16>, vector<8x32xf32> -> vector<8x32xf32>
    %110 = arith.addf %84, %109 : vector<8x32xf32>
    %111 = vector.broadcast %3 : vector<1x32xf32> to vector<8x32xf32>
    %112 = arith.addf %110, %111 : vector<8x32xf32>
    %cst_34 = arith.constant 0.000000e+00 : f32
    %113 = vector.broadcast %cst_34 : f32 to vector<8x32xf32>
    %114 = vector.extract_strided_slice %5 {offsets = [8, 0], sizes = [8, 16], strides = [1, 1]} : vector<16x192xf32> to vector<8x16xf32>
    %115 = arith.truncf %114 : vector<8x16xf32> to vector<8x16xbf16>
    %116 = vector.extract_strided_slice %5 {offsets = [8, 64], sizes = [8, 16], strides = [1, 1]} : vector<16x192xf32> to vector<8x16xf32>
    %117 = arith.truncf %116 : vector<8x16xf32> to vector<8x16xbf16>
    %118 = vector.extract_strided_slice %5 {offsets = [8, 128], sizes = [8, 16], strides = [1, 1]} : vector<16x192xf32> to vector<8x16xf32>
    %119 = arith.truncf %118 : vector<8x16xf32> to vector<8x16xbf16>
    %cst_35 = arith.constant dense<0.000000e+00> : vector<8x8xf32>
    %120 = tpu.matmul %115, %117, %cst_35 {dimension_numbers = #tpu.dot_dimension_numbers<[1], [1], [0], [0], [0, 0, 1, 0], [], []>} : vector<8x16xbf16>, vector<8x16xbf16>, vector<8x8xf32> -> vector<8x8xf32>
    %cst_36 = arith.constant 6.250000e-02 : f32
    %121 = vector.broadcast %cst_36 : f32 to vector<8x8xf32>
    %122 = arith.mulf %120, %121 : vector<8x8xf32>
    %123 = arith.addf %122, %4 : vector<8x8xf32>
    %cst_37 = arith.constant dense<0xFF800000> : vector<8xf32>
    %124 = vector.multi_reduction <maximumf>, %123, %cst_37 [1] : vector<8x8xf32> to vector<8xf32>
    %125 = vector.shape_cast %124 : vector<8xf32> to vector<8x1xf32>
    %126 = vector.broadcast %125 : vector<8x1xf32> to vector<8x8xf32>
    %127 = arith.subf %123, %126 : vector<8x8xf32>
    %128 = math.exp %127 : vector<8x8xf32>
    %cst_38 = arith.constant dense<0.000000e+00> : vector<8xf32>
    %129 = vector.multi_reduction <add>, %128, %cst_38 [1] : vector<8x8xf32> to vector<8xf32>
    %130 = vector.shape_cast %129 : vector<8xf32> to vector<8x1xf32>
    %131 = tpu.reciprocal %130 {approx = true} : vector<8x1xf32> -> vector<8x1xf32>
    %132 = arith.truncf %128 : vector<8x8xf32> to vector<8x8xbf16>
    %cst_39 = arith.constant dense<0.000000e+00> : vector<8x16xf32>
    %133 = tpu.matmul %132, %119, %cst_39 {dimension_numbers = #tpu.dot_dimension_numbers<[1], [0], [0], [1], [0, 0, 1, 1], [], []>} : vector<8x8xbf16>, vector<8x16xbf16>, vector<8x16xf32> -> vector<8x16xf32>
    %134 = vector.broadcast %131 : vector<8x1xf32> to vector<8x16xf32>
    %135 = arith.mulf %133, %134 : vector<8x16xf32>
    %136 = arith.truncf %135 : vector<8x16xf32> to vector<8x16xbf16>
    %137 = vector.extract_strided_slice %2 {offsets = [0, 0], sizes = [16, 32], strides = [1, 1]} : vector<64x32xbf16> to vector<16x32xbf16>
    %cst_40 = arith.constant dense<0.000000e+00> : vector<8x32xf32>
    %138 = tpu.matmul %136, %137, %cst_40 {dimension_numbers = #tpu.dot_dimension_numbers<[1], [0], [0], [1], [0, 0, 1, 1], [], []>} : vector<8x16xbf16>, vector<16x32xbf16>, vector<8x32xf32> -> vector<8x32xf32>
    %139 = arith.addf %113, %138 : vector<8x32xf32>
    %140 = vector.extract_strided_slice %5 {offsets = [8, 16], sizes = [8, 16], strides = [1, 1]} : vector<16x192xf32> to vector<8x16xf32>
    %141 = arith.truncf %140 : vector<8x16xf32> to vector<8x16xbf16>
    %142 = vector.extract_strided_slice %5 {offsets = [8, 80], sizes = [8, 16], strides = [1, 1]} : vector<16x192xf32> to vector<8x16xf32>
    %143 = arith.truncf %142 : vector<8x16xf32> to vector<8x16xbf16>
    %144 = vector.extract_strided_slice %5 {offsets = [8, 144], sizes = [8, 16], strides = [1, 1]} : vector<16x192xf32> to vector<8x16xf32>
    %145 = arith.truncf %144 : vector<8x16xf32> to vector<8x16xbf16>
    %cst_41 = arith.constant dense<0.000000e+00> : vector<8x8xf32>
    %146 = tpu.matmul %141, %143, %cst_41 {dimension_numbers = #tpu.dot_dimension_numbers<[1], [1], [0], [0], [0, 0, 1, 0], [], []>} : vector<8x16xbf16>, vector<8x16xbf16>, vector<8x8xf32> -> vector<8x8xf32>
    %cst_42 = arith.constant 6.250000e-02 : f32
    %147 = vector.broadcast %cst_42 : f32 to vector<8x8xf32>
    %148 = arith.mulf %146, %147 : vector<8x8xf32>
    %149 = arith.addf %148, %4 : vector<8x8xf32>
    %cst_43 = arith.constant dense<0xFF800000> : vector<8xf32>
    %150 = vector.multi_reduction <maximumf>, %149, %cst_43 [1] : vector<8x8xf32> to vector<8xf32>
    %151 = vector.shape_cast %150 : vector<8xf32> to vector<8x1xf32>
    %152 = vector.broadcast %151 : vector<8x1xf32> to vector<8x8xf32>
    %153 = arith.subf %149, %152 : vector<8x8xf32>
    %154 = math.exp %153 : vector<8x8xf32>
    %cst_44 = arith.constant dense<0.000000e+00> : vector<8xf32>
    %155 = vector.multi_reduction <add>, %154, %cst_44 [1] : vector<8x8xf32> to vector<8xf32>
    %156 = vector.shape_cast %155 : vector<8xf32> to vector<8x1xf32>
    %157 = tpu.reciprocal %156 {approx = true} : vector<8x1xf32> -> vector<8x1xf32>
    %158 = arith.truncf %154 : vector<8x8xf32> to vector<8x8xbf16>
    %cst_45 = arith.constant dense<0.000000e+00> : vector<8x16xf32>
    %159 = tpu.matmul %158, %145, %cst_45 {dimension_numbers = #tpu.dot_dimension_numbers<[1], [0], [0], [1], [0, 0, 1, 1], [], []>} : vector<8x8xbf16>, vector<8x16xbf16>, vector<8x16xf32> -> vector<8x16xf32>
    %160 = vector.broadcast %157 : vector<8x1xf32> to vector<8x16xf32>
    %161 = arith.mulf %159, %160 : vector<8x16xf32>
    %162 = arith.truncf %161 : vector<8x16xf32> to vector<8x16xbf16>
    %163 = vector.extract_strided_slice %2 {offsets = [16, 0], sizes = [16, 32], strides = [1, 1]} : vector<64x32xbf16> to vector<16x32xbf16>
    %cst_46 = arith.constant dense<0.000000e+00> : vector<8x32xf32>
    %164 = tpu.matmul %162, %163, %cst_46 {dimension_numbers = #tpu.dot_dimension_numbers<[1], [0], [0], [1], [0, 0, 1, 1], [], []>} : vector<8x16xbf16>, vector<16x32xbf16>, vector<8x32xf32> -> vector<8x32xf32>
    %165 = arith.addf %139, %164 : vector<8x32xf32>
    %166 = vector.extract_strided_slice %5 {offsets = [8, 32], sizes = [8, 16], strides = [1, 1]} : vector<16x192xf32> to vector<8x16xf32>
    %167 = arith.truncf %166 : vector<8x16xf32> to vector<8x16xbf16>
    %168 = vector.extract_strided_slice %5 {offsets = [8, 96], sizes = [8, 16], strides = [1, 1]} : vector<16x192xf32> to vector<8x16xf32>
    %169 = arith.truncf %168 : vector<8x16xf32> to vector<8x16xbf16>
    %170 = vector.extract_strided_slice %5 {offsets = [8, 160], sizes = [8, 16], strides = [1, 1]} : vector<16x192xf32> to vector<8x16xf32>
    %171 = arith.truncf %170 : vector<8x16xf32> to vector<8x16xbf16>
    %cst_47 = arith.constant dense<0.000000e+00> : vector<8x8xf32>
    %172 = tpu.matmul %167, %169, %cst_47 {dimension_numbers = #tpu.dot_dimension_numbers<[1], [1], [0], [0], [0, 0, 1, 0], [], []>} : vector<8x16xbf16>, vector<8x16xbf16>, vector<8x8xf32> -> vector<8x8xf32>
    %cst_48 = arith.constant 6.250000e-02 : f32
    %173 = vector.broadcast %cst_48 : f32 to vector<8x8xf32>
    %174 = arith.mulf %172, %173 : vector<8x8xf32>
    %175 = arith.addf %174, %4 : vector<8x8xf32>
    %cst_49 = arith.constant dense<0xFF800000> : vector<8xf32>
    %176 = vector.multi_reduction <maximumf>, %175, %cst_49 [1] : vector<8x8xf32> to vector<8xf32>
    %177 = vector.shape_cast %176 : vector<8xf32> to vector<8x1xf32>
    %178 = vector.broadcast %177 : vector<8x1xf32> to vector<8x8xf32>
    %179 = arith.subf %175, %178 : vector<8x8xf32>
    %180 = math.exp %179 : vector<8x8xf32>
    %cst_50 = arith.constant dense<0.000000e+00> : vector<8xf32>
    %181 = vector.multi_reduction <add>, %180, %cst_50 [1] : vector<8x8xf32> to vector<8xf32>
    %182 = vector.shape_cast %181 : vector<8xf32> to vector<8x1xf32>
    %183 = tpu.reciprocal %182 {approx = true} : vector<8x1xf32> -> vector<8x1xf32>
    %184 = arith.truncf %180 : vector<8x8xf32> to vector<8x8xbf16>
    %cst_51 = arith.constant dense<0.000000e+00> : vector<8x16xf32>
    %185 = tpu.matmul %184, %171, %cst_51 {dimension_numbers = #tpu.dot_dimension_numbers<[1], [0], [0], [1], [0, 0, 1, 1], [], []>} : vector<8x8xbf16>, vector<8x16xbf16>, vector<8x16xf32> -> vector<8x16xf32>
    %186 = vector.broadcast %183 : vector<8x1xf32> to vector<8x16xf32>
    %187 = arith.mulf %185, %186 : vector<8x16xf32>
    %188 = arith.truncf %187 : vector<8x16xf32> to vector<8x16xbf16>
    %189 = vector.extract_strided_slice %2 {offsets = [32, 0], sizes = [16, 32], strides = [1, 1]} : vector<64x32xbf16> to vector<16x32xbf16>
    %cst_52 = arith.constant dense<0.000000e+00> : vector<8x32xf32>
    %190 = tpu.matmul %188, %189, %cst_52 {dimension_numbers = #tpu.dot_dimension_numbers<[1], [0], [0], [1], [0, 0, 1, 1], [], []>} : vector<8x16xbf16>, vector<16x32xbf16>, vector<8x32xf32> -> vector<8x32xf32>
    %191 = arith.addf %165, %190 : vector<8x32xf32>
    %192 = vector.extract_strided_slice %5 {offsets = [8, 48], sizes = [8, 16], strides = [1, 1]} : vector<16x192xf32> to vector<8x16xf32>
    %193 = arith.truncf %192 : vector<8x16xf32> to vector<8x16xbf16>
    %194 = vector.extract_strided_slice %5 {offsets = [8, 112], sizes = [8, 16], strides = [1, 1]} : vector<16x192xf32> to vector<8x16xf32>
    %195 = arith.truncf %194 : vector<8x16xf32> to vector<8x16xbf16>
    %196 = vector.extract_strided_slice %5 {offsets = [8, 176], sizes = [8, 16], strides = [1, 1]} : vector<16x192xf32> to vector<8x16xf32>
    %197 = arith.truncf %196 : vector<8x16xf32> to vector<8x16xbf16>
    %cst_53 = arith.constant dense<0.000000e+00> : vector<8x8xf32>
    %198 = tpu.matmul %193, %195, %cst_53 {dimension_numbers = #tpu.dot_dimension_numbers<[1], [1], [0], [0], [0, 0, 1, 0], [], []>} : vector<8x16xbf16>, vector<8x16xbf16>, vector<8x8xf32> -> vector<8x8xf32>
    %cst_54 = arith.constant 6.250000e-02 : f32
    %199 = vector.broadcast %cst_54 : f32 to vector<8x8xf32>
    %200 = arith.mulf %198, %199 : vector<8x8xf32>
    %201 = arith.addf %200, %4 : vector<8x8xf32>
    %cst_55 = arith.constant dense<0xFF800000> : vector<8xf32>
    %202 = vector.multi_reduction <maximumf>, %201, %cst_55 [1] : vector<8x8xf32> to vector<8xf32>
    %203 = vector.shape_cast %202 : vector<8xf32> to vector<8x1xf32>
    %204 = vector.broadcast %203 : vector<8x1xf32> to vector<8x8xf32>
    %205 = arith.subf %201, %204 : vector<8x8xf32>
    %206 = math.exp %205 : vector<8x8xf32>
    %cst_56 = arith.constant dense<0.000000e+00> : vector<8xf32>
    %207 = vector.multi_reduction <add>, %206, %cst_56 [1] : vector<8x8xf32> to vector<8xf32>
    %208 = vector.shape_cast %207 : vector<8xf32> to vector<8x1xf32>
    %209 = tpu.reciprocal %208 {approx = true} : vector<8x1xf32> -> vector<8x1xf32>
    %210 = arith.truncf %206 : vector<8x8xf32> to vector<8x8xbf16>
    %cst_57 = arith.constant dense<0.000000e+00> : vector<8x16xf32>
    %211 = tpu.matmul %210, %197, %cst_57 {dimension_numbers = #tpu.dot_dimension_numbers<[1], [0], [0], [1], [0, 0, 1, 1], [], []>} : vector<8x8xbf16>, vector<8x16xbf16>, vector<8x16xf32> -> vector<8x16xf32>
    %212 = vector.broadcast %209 : vector<8x1xf32> to vector<8x16xf32>
    %213 = arith.mulf %211, %212 : vector<8x16xf32>
    %214 = arith.truncf %213 : vector<8x16xf32> to vector<8x16xbf16>
    %215 = vector.extract_strided_slice %2 {offsets = [48, 0], sizes = [16, 32], strides = [1, 1]} : vector<64x32xbf16> to vector<16x32xbf16>
    %cst_58 = arith.constant dense<0.000000e+00> : vector<8x32xf32>
    %216 = tpu.matmul %214, %215, %cst_58 {dimension_numbers = #tpu.dot_dimension_numbers<[1], [0], [0], [1], [0, 0, 1, 1], [], []>} : vector<8x16xbf16>, vector<16x32xbf16>, vector<8x32xf32> -> vector<8x32xf32>
    %217 = arith.addf %191, %216 : vector<8x32xf32>
    %218 = vector.broadcast %3 : vector<1x32xf32> to vector<8x32xf32>
    %219 = arith.addf %217, %218 : vector<8x32xf32>
    %220 = tpu.concatenate %112, %219 in 0 : vector<8x32xf32>, vector<8x32xf32> -> vector<16x32xf32>
    %c0_59 = arith.constant 0 : index
    %c0_60 = arith.constant 0 : index
    %221 = vector.load %arg6[%c0_59, %c0_60] : memref<16x32xf32, #tpu.memory_space<vmem>>, vector<16x32xf32>
    tpu.vector_store %arg6[%c0_59, %c0_60], %220 {strides = array<i32>} : memref<16x32xf32, #tpu.memory_space<vmem>>, vector<16x32xf32>,
    return
  }
  func.func @transform_0(%arg0: i32) -> (i32, i32) {
    %c0_i32 = arith.constant 0 : i32
    %c0_i32_0 = arith.constant 0 : i32
    return %arg0, %c0_i32 : i32, i32
  }
  func.func @transform_1(%arg0: i32) -> (i32, i32) {
    %c0_i32 = arith.constant 0 : i32
    %c0_i32_0 = arith.constant 0 : i32
    %c0_i32_1 = arith.constant 0 : i32
    return %c0_i32, %c0_i32_0 : i32, i32
  }
  func.func @transform_2(%arg0: i32) -> (i32, i32) {
    %c0_i32 = arith.constant 0 : i32
    %c0_i32_0 = arith.constant 0 : i32
    %c0_i32_1 = arith.constant 0 : i32
    return %c0_i32, %c0_i32_0 : i32, i32
  }
  func.func @transform_3(%arg0: i32) -> (i32, i32) {
    %c0_i32 = arith.constant 0 : i32
    %c0_i32_0 = arith.constant 0 : i32
    %c0_i32_1 = arith.constant 0 : i32
    return %c0_i32, %c0_i32_0 : i32, i32
  }
  func.func @transform_4(%arg0: i32) -> (i32, i32) {
    %c0_i32 = arith.constant 0 : i32
    %c0_i32_0 = arith.constant 0 : i32
    %c0_i32_1 = arith.constant 0 : i32
    return %c0_i32, %c0_i32_0 : i32, i32
  }
  func.func @transform_5(%arg0: i32) -> (i32, i32) {
    %c0_i32 = arith.constant 0 : i32
    %c0_i32_0 = arith.constant 0 : i32
    return %arg0, %c0_i32 : i32, i32
  }
}

module attributes {stable_mosaic.version = 11 : i64} {
  func.func @self_attention_kernel(%arg0: i32, %arg1: memref<16x32xbf16, #tpu.memory_space<vmem>>, %arg2: memref<32x192xbf16, #tpu.memory_space<vmem>>, %arg3: memref<64x32xbf16, #tpu.memory_space<vmem>>, %arg4: memref<1x32xf32, #tpu.memory_space<vmem>>, %arg5: memref<8x8xf32, #tpu.memory_space<vmem>>, %arg6: memref<16x32xf32, #tpu.memory_space<vmem>>) attributes {dimension_semantics = [#tpu.dimension_semantics<parallel>], iteration_bounds = array<i64: 1>, scalar_prefetch = 0 : i64, scratch_operands = 0 : i64, tpu.core_type = #tpu.core_type<tc>, window_params = [{transform_indices = @transform_0, window_bounds = array<i64: 16, 32>}, {pipeline_mode = #tpu.pipeline_mode<synchronous>, transform_indices = @transform_1, window_bounds = array<i64: 32, 192>}, {pipeline_mode = #tpu.pipeline_mode<synchronous>, transform_indices = @transform_2, window_bounds = array<i64: 64, 32>}, {pipeline_mode = #tpu.pipeline_mode<synchronous>, transform_indices = @transform_3, window_bounds = array<i64: 1, 32>}, {pipeline_mode = #tpu.pipeline_mode<synchronous>, transform_indices = @transform_4, window_bounds = array<i64: 8, 8>}, {transform_indices = @transform_5, window_bounds = array<i64: 16, 32>}]} {
    %c0 = arith.constant 0 : index
    %c0_0 = arith.constant 0 : index
    %0 = vector.load %arg1[%c0, %c0_0] : memref<16x32xbf16, #tpu.memory_space<vmem>>, vector<16x32xbf16>
    %c0_1 = arith.constant 0 : index
    %c0_2 = arith.constant 0 : index
    %1 = vector.load %arg2[%c0_1, %c0_2] : memref<32x192xbf16, #tpu.memory_space<vmem>>, vector<32x192xbf16>
    %c0_3 = arith.constant 0 : index
    %c0_4 = arith.constant 0 : index
    %2 = vector.load %arg3[%c0_3, %c0_4] : memref<64x32xbf16, #tpu.memory_space<vmem>>, vector<64x32xbf16>
    %c0_5 = arith.constant 0 : index
    %c0_6 = arith.constant 0 : index
    %3 = vector.load %arg4[%c0_5, %c0_6] : memref<1x32xf32, #tpu.memory_space<vmem>>, vector<1x32xf32>
    %c0_7 = arith.constant 0 : index
    %c0_8 = arith.constant 0 : index
    %4 = vector.load %arg5[%c0_7, %c0_8] : memref<8x8xf32, #tpu.memory_space<vmem>>, vector<8x8xf32>
    %cst = arith.constant dense<0.000000e+00> : vector<16x192xf32>
    %5 = tpu.matmul %0, %1, %cst {dimension_numbers = #tpu.dot_dimension_numbers<[1], [0], [0], [1], [0, 0, 1, 1], [], []>} : vector<16x32xbf16>, vector<32x192xbf16>, vector<16x192xf32> -> vector<16x192xf32>
    %cst_9 = arith.constant 0.000000e+00 : f32
    %6 = vector.broadcast %cst_9 : f32 to vector<8x32xf32>
    %7 = vector.extract_strided_slice %5 {offsets = [0, 0], sizes = [8, 16], strides = [1, 1]} : vector<16x192xf32> to vector<8x16xf32>
    %8 = arith.truncf %7 : vector<8x16xf32> to vector<8x16xbf16>
    %9 = vector.extract_strided_slice %5 {offsets = [0, 64], sizes = [8, 16], strides = [1, 1]} : vector<16x192xf32> to vector<8x16xf32>
    %10 = arith.truncf %9 : vector<8x16xf32> to vector<8x16xbf16>
    %11 = vector.extract_strided_slice %5 {offsets = [0, 128], sizes = [8, 16], strides = [1, 1]} : vector<16x192xf32> to vector<8x16xf32>
    %12 = arith.truncf %11 : vector<8x16xf32> to vector<8x16xbf16>
    %cst_10 = arith.constant dense<0.000000e+00> : vector<8x8xf32>
    %13 = tpu.matmul %8, %10, %cst_10 {dimension_numbers = #tpu.dot_dimension_numbers<[1], [1], [0], [0], [0, 0, 1, 0], [], []>} : vector<8x16xbf16>, vector<8x16xbf16>, vector<8x8xf32> -> vector<8x8xf32>
    %cst_11 = arith.constant 6.250000e-02 : f32
    %14 = vector.broadcast %cst_11 : f32 to vector<8x8xf32>
    %15 = arith.mulf %13, %14 : vector<8x8xf32>
    %16 = arith.addf %15, %4 : vector<8x8xf32>
    %cst_12 = arith.constant dense<0xFF800000> : vector<8xf32>
    %17 = vector.multi_reduction <maximumf>, %16, %cst_12 [1] : vector<8x8xf32> to vector<8xf32>
    %18 = vector.shape_cast %17 : vector<8xf32> to vector<8x1xf32>
    %19 = vector.broadcast %18 : vector<8x1xf32> to vector<8x8xf32>
    %20 = arith.subf %16, %19 : vector<8x8xf32>
    %21 = math.exp %20 : vector<8x8xf32>
    %cst_13 = arith.constant dense<0.000000e+00> : vector<8xf32>
    %22 = vector.multi_reduction <add>, %21, %cst_13 [1] : vector<8x8xf32> to vector<8xf32>
    %23 = vector.shape_cast %22 : vector<8xf32> to vector<8x1xf32>
    %24 = tpu.reciprocal %23 {approx = true} : vector<8x1xf32> -> vector<8x1xf32>
    %25 = arith.truncf %21 : vector<8x8xf32> to vector<8x8xbf16>
    %cst_14 = arith.constant dense<0.000000e+00> : vector<8x16xf32>
    %26 = tpu.matmul %25, %12, %cst_14 {dimension_numbers = #tpu.dot_dimension_numbers<[1], [0], [0], [1], [0, 0, 1, 1], [], []>} : vector<8x8xbf16>, vector<8x16xbf16>, vector<8x16xf32> -> vector<8x16xf32>
    %27 = vector.broadcast %24 : vector<8x1xf32> to vector<8x16xf32>
    %28 = arith.mulf %26, %27 : vector<8x16xf32>
    %29 = arith.truncf %28 : vector<8x16xf32> to vector<8x16xbf16>
    %30 = vector.extract_strided_slice %2 {offsets = [0, 0], sizes = [16, 32], strides = [1, 1]} : vector<64x32xbf16> to vector<16x32xbf16>
    %cst_15 = arith.constant dense<0.000000e+00> : vector<8x32xf32>
    %31 = tpu.matmul %29, %30, %cst_15 {dimension_numbers = #tpu.dot_dimension_numbers<[1], [0], [0], [1], [0, 0, 1, 1], [], []>} : vector<8x16xbf16>, vector<16x32xbf16>, vector<8x32xf32> -> vector<8x32xf32>
    %32 = arith.addf %6, %31 : vector<8x32xf32>
    %33 = vector.extract_strided_slice %5 {offsets = [0, 16], sizes = [8, 16], strides = [1, 1]} : vector<16x192xf32> to vector<8x16xf32>
    %34 = arith.truncf %33 : vector<8x16xf32> to vector<8x16xbf16>
    %35 = vector.extract_strided_slice %5 {offsets = [0, 80], sizes = [8, 16], strides = [1, 1]} : vector<16x192xf32> to vector<8x16xf32>
    %36 = arith.truncf %35 : vector<8x16xf32> to vector<8x16xbf16>
    %37 = vector.extract_strided_slice %5 {offsets = [0, 144], sizes = [8, 16], strides = [1, 1]} : vector<16x192xf32> to vector<8x16xf32>
    %38 = arith.truncf %37 : vector<8x16xf32> to vector<8x16xbf16>
    %cst_16 = arith.constant dense<0.000000e+00> : vector<8x8xf32>
    %39 = tpu.matmul %34, %36, %cst_16 {dimension_numbers = #tpu.dot_dimension_numbers<[1], [1], [0], [0], [0, 0, 1, 0], [], []>} : vector<8x16xbf16>, vector<8x16xbf16>, vector<8x8xf32> -> vector<8x8xf32>
    %cst_17 = arith.constant 6.250000e-02 : f32
    %40 = vector.broadcast %cst_17 : f32 to vector<8x8xf32>
    %41 = arith.mulf %39, %40 : vector<8x8xf32>
    %42 = arith.addf %41, %4 : vector<8x8xf32>
    %cst_18 = arith.constant dense<0xFF800000> : vector<8xf32>
    %43 = vector.multi_reduction <maximumf>, %42, %cst_18 [1] : vector<8x8xf32> to vector<8xf32>
    %44 = vector.shape_cast %43 : vector<8xf32> to vector<8x1xf32>
    %45 = vector.broadcast %44 : vector<8x1xf32> to vector<8x8xf32>
    %46 = arith.subf %42, %45 : vector<8x8xf32>
    %47 = math.exp %46 : vector<8x8xf32>
    %cst_19 = arith.constant dense<0.000000e+00> : vector<8xf32>
    %48 = vector.multi_reduction <add>, %47, %cst_19 [1] : vector<8x8xf32> to vector<8xf32>
    %49 = vector.shape_cast %48 : vector<8xf32> to vector<8x1xf32>
    %50 = tpu.reciprocal %49 {approx = true} : vector<8x1xf32> -> vector<8x1xf32>
    %51 = arith.truncf %47 : vector<8x8xf32> to vector<8x8xbf16>
    %cst_20 = arith.constant dense<0.000000e+00> : vector<8x16xf32>
    %52 = tpu.matmul %51, %38, %cst_20 {dimension_numbers = #tpu.dot_dimension_numbers<[1], [0], [0], [1], [0, 0, 1, 1], [], []>} : vector<8x8xbf16>, vector<8x16xbf16>, vector<8x16xf32> -> vector<8x16xf32>
    %53 = vector.broadcast %50 : vector<8x1xf32> to vector<8x16xf32>
    %54 = arith.mulf %52, %53 : vector<8x16xf32>
    %55 = arith.truncf %54 : vector<8x16xf32> to vector<8x16xbf16>
    %56 = vector.extract_strided_slice %2 {offsets = [16, 0], sizes = [16, 32], strides = [1, 1]} : vector<64x32xbf16> to vector<16x32xbf16>
    %cst_21 = arith.constant dense<0.000000e+00> : vector<8x32xf32>
    %57 = tpu.matmul %55, %56, %cst_21 {dimension_numbers = #tpu.dot_dimension_numbers<[1], [0], [0], [1], [0, 0, 1, 1], [], []>} : vector<8x16xbf16>, vector<16x32xbf16>, vector<8x32xf32> -> vector<8x32xf32>
    %58 = arith.addf %32, %57 : vector<8x32xf32>
    %59 = vector.extract_strided_slice %5 {offsets = [0, 32], sizes = [8, 16], strides = [1, 1]} : vector<16x192xf32> to vector<8x16xf32>
    %60 = arith.truncf %59 : vector<8x16xf32> to vector<8x16xbf16>
    %61 = vector.extract_strided_slice %5 {offsets = [0, 96], sizes = [8, 16], strides = [1, 1]} : vector<16x192xf32> to vector<8x16xf32>
    %62 = arith.truncf %61 : vector<8x16xf32> to vector<8x16xbf16>
    %63 = vector.extract_strided_slice %5 {offsets = [0, 160], sizes = [8, 16], strides = [1, 1]} : vector<16x192xf32> to vector<8x16xf32>
    %64 = arith.truncf %63 : vector<8x16xf32> to vector<8x16xbf16>
    %cst_22 = arith.constant dense<0.000000e+00> : vector<8x8xf32>
    %65 = tpu.matmul %60, %62, %cst_22 {dimension_numbers = #tpu.dot_dimension_numbers<[1], [1], [0], [0], [0, 0, 1, 0], [], []>} : vector<8x16xbf16>, vector<8x16xbf16>, vector<8x8xf32> -> vector<8x8xf32>
    %cst_23 = arith.constant 6.250000e-02 : f32
    %66 = vector.broadcast %cst_23 : f32 to vector<8x8xf32>
    %67 = arith.mulf %65, %66 : vector<8x8xf32>
    %68 = arith.addf %67, %4 : vector<8x8xf32>
    %cst_24 = arith.constant dense<0xFF800000> : vector<8xf32>
    %69 = vector.multi_reduction <maximumf>, %68, %cst_24 [1] : vector<8x8xf32> to vector<8xf32>
    %70 = vector.shape_cast %69 : vector<8xf32> to vector<8x1xf32>
    %71 = vector.broadcast %70 : vector<8x1xf32> to vector<8x8xf32>
    %72 = arith.subf %68, %71 : vector<8x8xf32>
    %73 = math.exp %72 : vector<8x8xf32>
    %cst_25 = arith.constant dense<0.000000e+00> : vector<8xf32>
    %74 = vector.multi_reduction <add>, %73, %cst_25 [1] : vector<8x8xf32> to vector<8xf32>
    %75 = vector.shape_cast %74 : vector<8xf32> to vector<8x1xf32>
    %76 = tpu.reciprocal %75 {approx = true} : vector<8x1xf32> -> vector<8x1xf32>
    %77 = arith.truncf %73 : vector<8x8xf32> to vector<8x8xbf16>
    %cst_26 = arith.constant dense<0.000000e+00> : vector<8x16xf32>
    %78 = tpu.matmul %77, %64, %cst_26 {dimension_numbers = #tpu.dot_dimension_numbers<[1], [0], [0], [1], [0, 0, 1, 1], [], []>} : vector<8x8xbf16>, vector<8x16xbf16>, vector<8x16xf32> -> vector<8x16xf32>
    %79 = vector.broadcast %76 : vector<8x1xf32> to vector<8x16xf32>
    %80 = arith.mulf %78, %79 : vector<8x16xf32>
    %81 = arith.truncf %80 : vector<8x16xf32> to vector<8x16xbf16>
    %82 = vector.extract_strided_slice %2 {offsets = [32, 0], sizes = [16, 32], strides = [1, 1]} : vector<64x32xbf16> to vector<16x32xbf16>
    %cst_27 = arith.constant dense<0.000000e+00> : vector<8x32xf32>
    %83 = tpu.matmul %81, %82, %cst_27 {dimension_numbers = #tpu.dot_dimension_numbers<[1], [0], [0], [1], [0, 0, 1, 1], [], []>} : vector<8x16xbf16>, vector<16x32xbf16>, vector<8x32xf32> -> vector<8x32xf32>
    %84 = arith.addf %58, %83 : vector<8x32xf32>
    %85 = vector.extract_strided_slice %5 {offsets = [0, 48], sizes = [8, 16], strides = [1, 1]} : vector<16x192xf32> to vector<8x16xf32>
    %86 = arith.truncf %85 : vector<8x16xf32> to vector<8x16xbf16>
    %87 = vector.extract_strided_slice %5 {offsets = [0, 112], sizes = [8, 16], strides = [1, 1]} : vector<16x192xf32> to vector<8x16xf32>
    %88 = arith.truncf %87 : vector<8x16xf32> to vector<8x16xbf16>
    %89 = vector.extract_strided_slice %5 {offsets = [0, 176], sizes = [8, 16], strides = [1, 1]} : vector<16x192xf32> to vector<8x16xf32>
    %90 = arith.truncf %89 : vector<8x16xf32> to vector<8x16xbf16>
    %cst_28 = arith.constant dense<0.000000e+00> : vector<8x8xf32>
    %91 = tpu.matmul %86, %88, %cst_28 {dimension_numbers = #tpu.dot_dimension_numbers<[1], [1], [0], [0], [0, 0, 1, 0], [], []>} : vector<8x16xbf16>, vector<8x16xbf16>, vector<8x8xf32> -> vector<8x8xf32>
    %cst_29 = arith.constant 6.250000e-02 : f32
    %92 = vector.broadcast %cst_29 : f32 to vector<8x8xf32>
    %93 = arith.mulf %91, %92 : vector<8x8xf32>
    %94 = arith.addf %93, %4 : vector<8x8xf32>
    %cst_30 = arith.constant dense<0xFF800000> : vector<8xf32>
    %95 = vector.multi_reduction <maximumf>, %94, %cst_30 [1] : vector<8x8xf32> to vector<8xf32>
    %96 = vector.shape_cast %95 : vector<8xf32> to vector<8x1xf32>
    %97 = vector.broadcast %96 : vector<8x1xf32> to vector<8x8xf32>
    %98 = arith.subf %94, %97 : vector<8x8xf32>
    %99 = math.exp %98 : vector<8x8xf32>
    %cst_31 = arith.constant dense<0.000000e+00> : vector<8xf32>
    %100 = vector.multi_reduction <add>, %99, %cst_31 [1] : vector<8x8xf32> to vector<8xf32>
    %101 = vector.shape_cast %100 : vector<8xf32> to vector<8x1xf32>
    %102 = tpu.reciprocal %101 {approx = true} : vector<8x1xf32> -> vector<8x1xf32>
    %103 = arith.truncf %99 : vector<8x8xf32> to vector<8x8xbf16>
    %cst_32 = arith.constant dense<0.000000e+00> : vector<8x16xf32>
    %104 = tpu.matmul %103, %90, %cst_32 {dimension_numbers = #tpu.dot_dimension_numbers<[1], [0], [0], [1], [0, 0, 1, 1], [], []>} : vector<8x8xbf16>, vector<8x16xbf16>, vector<8x16xf32> -> vector<8x16xf32>
    %105 = vector.broadcast %102 : vector<8x1xf32> to vector<8x16xf32>
    %106 = arith.mulf %104, %105 : vector<8x16xf32>
    %107 = arith.truncf %106 : vector<8x16xf32> to vector<8x16xbf16>
    %108 = vector.extract_strided_slice %2 {offsets = [48, 0], sizes = [16, 32], strides = [1, 1]} : vector<64x32xbf16> to vector<16x32xbf16>
    %cst_33 = arith.constant dense<0.000000e+00> : vector<8x32xf32>
    %109 = tpu.matmul %107, %108, %cst_33 {dimension_numbers = #tpu.dot_dimension_numbers<[1], [0], [0], [1], [0, 0, 1, 1], [], []>} : vector<8x16xbf16>, vector<16x32xbf16>, vector<8x32xf32> -> vector<8x32xf32>
    %110 = arith.addf %84, %109 : vector<8x32xf32>
    %111 = vector.broadcast %3 : vector<1x32xf32> to vector<8x32xf32>
    %112 = arith.addf %110, %111 : vector<8x32xf32>
    %cst_34 = arith.constant 0.000000e+00 : f32
    %113 = vector.broadcast %cst_34 : f32 to vector<8x32xf32>
    %114 = vector.extract_strided_slice %5 {offsets = [8, 0], sizes = [8, 16], strides = [1, 1]} : vector<16x192xf32> to vector<8x16xf32>
    %115 = arith.truncf %114 : vector<8x16xf32> to vector<8x16xbf16>
    %116 = vector.extract_strided_slice %5 {offsets = [8, 64], sizes = [8, 16], strides = [1, 1]} : vector<16x192xf32> to vector<8x16xf32>
    %117 = arith.truncf %116 : vector<8x16xf32> to vector<8x16xbf16>
    %118 = vector.extract_strided_slice %5 {offsets = [8, 128], sizes = [8, 16], strides = [1, 1]} : vector<16x192xf32> to vector<8x16xf32>
    %119 = arith.truncf %118 : vector<8x16xf32> to vector<8x16xbf16>
    %cst_35 = arith.constant dense<0.000000e+00> : vector<8x8xf32>
    %120 = tpu.matmul %115, %117, %cst_35 {dimension_numbers = #tpu.dot_dimension_numbers<[1], [1], [0], [0], [0, 0, 1, 0], [], []>} : vector<8x16xbf16>, vector<8x16xbf16>, vector<8x8xf32> -> vector<8x8xf32>
    %cst_36 = arith.constant 6.250000e-02 : f32
    %121 = vector.broadcast %cst_36 : f32 to vector<8x8xf32>
    %122 = arith.mulf %120, %121 : vector<8x8xf32>
    %123 = arith.addf %122, %4 : vector<8x8xf32>
    %cst_37 = arith.constant dense<0xFF800000> : vector<8xf32>
    %124 = vector.multi_reduction <maximumf>, %123, %cst_37 [1] : vector<8x8xf32> to vector<8xf32>
    %125 = vector.shape_cast %124 : vector<8xf32> to vector<8x1xf32>
    %126 = vector.broadcast %125 : vector<8x1xf32> to vector<8x8xf32>
    %127 = arith.subf %123, %126 : vector<8x8xf32>
    %128 = math.exp %127 : vector<8x8xf32>
    %cst_38 = arith.constant dense<0.000000e+00> : vector<8xf32>
    %129 = vector.multi_reduction <add>, %128, %cst_38 [1] : vector<8x8xf32> to vector<8xf32>
    %130 = vector.shape_cast %129 : vector<8xf32> to vector<8x1xf32>
    %131 = tpu.reciprocal %130 {approx = true} : vector<8x1xf32> -> vector<8x1xf32>
    %132 = arith.truncf %128 : vector<8x8xf32> to vector<8x8xbf16>
    %cst_39 = arith.constant dense<0.000000e+00> : vector<8x16xf32>
    %133 = tpu.matmul %132, %119, %cst_39 {dimension_numbers = #tpu.dot_dimension_numbers<[1], [0], [0], [1], [0, 0, 1, 1], [], []>} : vector<8x8xbf16>, vector<8x16xbf16>, vector<8x16xf32> -> vector<8x16xf32>
    %134 = vector.broadcast %131 : vector<8x1xf32> to vector<8x16xf32>
    %135 = arith.mulf %133, %134 : vector<8x16xf32>
    %136 = arith.truncf %135 : vector<8x16xf32> to vector<8x16xbf16>
    %137 = vector.extract_strided_slice %2 {offsets = [0, 0], sizes = [16, 32], strides = [1, 1]} : vector<64x32xbf16> to vector<16x32xbf16>
    %cst_40 = arith.constant dense<0.000000e+00> : vector<8x32xf32>
    %138 = tpu.matmul %136, %137, %cst_40 {dimension_numbers = #tpu.dot_dimension_numbers<[1], [0], [0], [1], [0, 0, 1, 1], [], []>} : vector<8x16xbf16>, vector<16x32xbf16>, vector<8x32xf32> -> vector<8x32xf32>
    %139 = arith.addf %113, %138 : vector<8x32xf32>
    %140 = vector.extract_strided_slice %5 {offsets = [8, 16], sizes = [8, 16], strides = [1, 1]} : vector<16x192xf32> to vector<8x16xf32>
    %141 = arith.truncf %140 : vector<8x16xf32> to vector<8x16xbf16>
    %142 = vector.extract_strided_slice %5 {offsets = [8, 80], sizes = [8, 16], strides = [1, 1]} : vector<16x192xf32> to vector<8x16xf32>
    %143 = arith.truncf %142 : vector<8x16xf32> to vector<8x16xbf16>
    %144 = vector.extract_strided_slice %5 {offsets = [8, 144], sizes = [8, 16], strides = [1, 1]} : vector<16x192xf32> to vector<8x16xf32>
    %145 = arith.truncf %144 : vector<8x16xf32> to vector<8x16xbf16>
    %cst_41 = arith.constant dense<0.000000e+00> : vector<8x8xf32>
    %146 = tpu.matmul %141, %143, %cst_41 {dimension_numbers = #tpu.dot_dimension_numbers<[1], [1], [0], [0], [0, 0, 1, 0], [], []>} : vector<8x16xbf16>, vector<8x16xbf16>, vector<8x8xf32> -> vector<8x8xf32>
    %cst_42 = arith.constant 6.250000e-02 : f32
    %147 = vector.broadcast %cst_42 : f32 to vector<8x8xf32>
    %148 = arith.mulf %146, %147 : vector<8x8xf32>
    %149 = arith.addf %148, %4 : vector<8x8xf32>
    %cst_43 = arith.constant dense<0xFF800000> : vector<8xf32>
    %150 = vector.multi_reduction <maximumf>, %149, %cst_43 [1] : vector<8x8xf32> to vector<8xf32>
    %151 = vector.shape_cast %150 : vector<8xf32> to vector<8x1xf32>
    %152 = vector.broadcast %151 : vector<8x1xf32> to vector<8x8xf32>
    %153 = arith.subf %149, %152 : vector<8x8xf32>
    %154 = math.exp %153 : vector<8x8xf32>
    %cst_44 = arith.constant dense<0.000000e+00> : vector<8xf32>
    %155 = vector.multi_reduction <add>, %154, %cst_44 [1] : vector<8x8xf32> to vector<8xf32>
    %156 = vector.shape_cast %155 : vector<8xf32> to vector<8x1xf32>
    %157 = tpu.reciprocal %156 {approx = true} : vector<8x1xf32> -> vector<8x1xf32>
    %158 = arith.truncf %154 : vector<8x8xf32> to vector<8x8xbf16>
    %cst_45 = arith.constant dense<0.000000e+00> : vector<8x16xf32>
    %159 = tpu.matmul %158, %145, %cst_45 {dimension_numbers = #tpu.dot_dimension_numbers<[1], [0], [0], [1], [0, 0, 1, 1], [], []>} : vector<8x8xbf16>, vector<8x16xbf16>, vector<8x16xf32> -> vector<8x16xf32>
    %160 = vector.broadcast %157 : vector<8x1xf32> to vector<8x16xf32>
    %161 = arith.mulf %159, %160 : vector<8x16xf32>
    %162 = arith.truncf %161 : vector<8x16xf32> to vector<8x16xbf16>
    %163 = vector.extract_strided_slice %2 {offsets = [16, 0], sizes = [16, 32], strides = [1, 1]} : vector<64x32xbf16> to vector<16x32xbf16>
    %cst_46 = arith.constant dense<0.000000e+00> : vector<8x32xf32>
    %164 = tpu.matmul %162, %163, %cst_46 {dimension_numbers = #tpu.dot_dimension_numbers<[1], [0], [0], [1], [0, 0, 1, 1], [], []>} : vector<8x16xbf16>, vector<16x32xbf16>, vector<8x32xf32> -> vector<8x32xf32>
    %165 = arith.addf %139, %164 : vector<8x32xf32>
    %166 = vector.extract_strided_slice %5 {offsets = [8, 32], sizes = [8, 16], strides = [1, 1]} : vector<16x192xf32> to vector<8x16xf32>
    %167 = arith.truncf %166 : vector<8x16xf32> to vector<8x16xbf16>
    %168 = vector.extract_strided_slice %5 {offsets = [8, 96], sizes = [8, 16], strides = [1, 1]} : vector<16x192xf32> to vector<8x16xf32>
    %169 = arith.truncf %168 : vector<8x16xf32> to vector<8x16xbf16>
    %170 = vector.extract_strided_slice %5 {offsets = [8, 160], sizes = [8, 16], strides = [1, 1]} : vector<16x192xf32> to vector<8x16xf32>
    %171 = arith.truncf %170 : vector<8x16xf32> to vector<8x16xbf16>
    %cst_47 = arith.constant dense<0.000000e+00> : vector<8x8xf32>
    %172 = tpu.matmul %167, %169, %cst_47 {dimension_numbers = #tpu.dot_dimension_numbers<[1], [1], [0], [0], [0, 0, 1, 0], [], []>} : vector<8x16xbf16>, vector<8x16xbf16>, vector<8x8xf32> -> vector<8x8xf32>
    %cst_48 = arith.constant 6.250000e-02 : f32
    %173 = vector.broadcast %cst_48 : f32 to vector<8x8xf32>
    %174 = arith.mulf %172, %173 : vector<8x8xf32>
    %175 = arith.addf %174, %4 : vector<8x8xf32>
    %cst_49 = arith.constant dense<0xFF800000> : vector<8xf32>
    %176 = vector.multi_reduction <maximumf>, %175, %cst_49 [1] : vector<8x8xf32> to vector<8xf32>
    %177 = vector.shape_cast %176 : vector<8xf32> to vector<8x1xf32>
    %178 = vector.broadcast %177 : vector<8x1xf32> to vector<8x8xf32>
    %179 = arith.subf %175, %178 : vector<8x8xf32>
    %180 = math.exp %179 : vector<8x8xf32>
    %cst_50 = arith.constant dense<0.000000e+00> : vector<8xf32>
    %181 = vector.multi_reduction <add>, %180, %cst_50 [1] : vector<8x8xf32> to vector<8xf32>
    %182 = vector.shape_cast %181 : vector<8xf32> to vector<8x1xf32>
    %183 = tpu.reciprocal %182 {approx = true} : vector<8x1xf32> -> vector<8x1xf32>
    %184 = arith.truncf %180 : vector<8x8xf32> to vector<8x8xbf16>
    %cst_51 = arith.constant dense<0.000000e+00> : vector<8x16xf32>
    %185 = tpu.matmul %184, %171, %cst_51 {dimension_numbers = #tpu.dot_dimension_numbers<[1], [0], [0], [1], [0, 0, 1, 1], [], []>} : vector<8x8xbf16>, vector<8x16xbf16>, vector<8x16xf32> -> vector<8x16xf32>
    %186 = vector.broadcast %183 : vector<8x1xf32> to vector<8x16xf32>
    %187 = arith.mulf %185, %186 : vector<8x16xf32>
    %188 = arith.truncf %187 : vector<8x16xf32> to vector<8x16xbf16>
    %189 = vector.extract_strided_slice %2 {offsets = [32, 0], sizes = [16, 32], strides = [1, 1]} : vector<64x32xbf16> to vector<16x32xbf16>
    %cst_52 = arith.constant dense<0.000000e+00> : vector<8x32xf32>
    %190 = tpu.matmul %188, %189, %cst_52 {dimension_numbers = #tpu.dot_dimension_numbers<[1], [0], [0], [1], [0, 0, 1, 1], [], []>} : vector<8x16xbf16>, vector<16x32xbf16>, vector<8x32xf32> -> vector<8x32xf32>
    %191 = arith.addf %165, %190 : vector<8x32xf32>
    %192 = vector.extract_strided_slice %5 {offsets = [8, 48], sizes = [8, 16], strides = [1, 1]} : vector<16x192xf32> to vector<8x16xf32>
    %193 = arith.truncf %192 : vector<8x16xf32> to vector<8x16xbf16>
    %194 = vector.extract_strided_slice %5 {offsets = [8, 112], sizes = [8, 16], strides = [1, 1]} : vector<16x192xf32> to vector<8x16xf32>
    %195 = arith.truncf %194 : vector<8x16xf32> to vector<8x16xbf16>
    %196 = vector.extract_strided_slice %5 {offsets = [8, 176], sizes = [8, 16], strides = [1, 1]} : vector<16x192xf32> to vector<8x16xf32>
    %197 = arith.truncf %196 : vector<8x16xf32> to vector<8x16xbf16>
    %cst_53 = arith.constant dense<0.000000e+00> : vector<8x8xf32>
    %198 = tpu.matmul %193, %195, %cst_53 {dimension_numbers = #tpu.dot_dimension_numbers<[1], [1], [0], [0], [0, 0, 1, 0], [], []>} : vector<8x16xbf16>, vector<8x16xbf16>, vector<8x8xf32> -> vector<8x8xf32>
    %cst_54 = arith.constant 6.250000e-02 : f32
    %199 = vector.broadcast %cst_54 : f32 to vector<8x8xf32>
    %200 = arith.mulf %198, %199 : vector<8x8xf32>
    %201 = arith.addf %200, %4 : vector<8x8xf32>
    %cst_55 = arith.constant dense<0xFF800000> : vector<8xf32>
    %202 = vector.multi_reduction <maximumf>, %201, %cst_55 [1] : vector<8x8xf32> to vector<8xf32>
    %203 = vector.shape_cast %202 : vector<8xf32> to vector<8x1xf32>
    %204 = vector.broadcast %203 : vector<8x1xf32> to vector<8x8xf32>
    %205 = arith.subf %201, %204 : vector<8x8xf32>
    %206 = math.exp %205 : vector<8x8xf32>
    %cst_56 = arith.constant dense<0.000000e+00> : vector<8xf32>
    %207 = vector.multi_reduction <add>, %206, %cst_56 [1] : vector<8x8xf32> to vector<8xf32>
    %208 = vector.shape_cast %207 : vector<8xf32> to vector<8x1xf32>
    %209 = tpu.reciprocal %208 {approx = true} : vector<8x1xf32> -> vector<8x1xf32>
    %210 = arith.truncf %206 : vector<8x8xf32> to vector<8x8xbf16>
    %cst_57 = arith.constant dense<0.000000e+00> : vector<8x16xf32>
    %211 = tpu.matmul %210, %197, %cst_57 {dimension_numbers = #tpu.dot_dimension_numbers<[1], [0], [0], [1], [0, 0, 1, 1], [], []>} : vector<8x8xbf16>, vector<8x16xbf16>, vector<8x16xf32> -> vector<8x16xf32>
    %212 = vector.broadcast %209 : vector<8x1xf32> to vector<8x16xf32>
    %213 = arith.mulf %211, %212 : vector<8x16xf32>
    %214 = arith.truncf %213 : vector<8x16xf32> to vector<8x16xbf16>
    %215 = vector.extract_strided_slice %2 {offsets = [48, 0], sizes = [16, 32], strides = [1, 1]} : vector<64x32xbf16> to vector<16x32xbf16>
    %cst_58 = arith.constant dense<0.000000e+00> : vector<8x32xf32>
    %216 = tpu.matmul %214, %215, %cst_58 {dimension_numbers = #tpu.dot_dimension_numbers<[1], [0], [0], [1], [0, 0, 1, 1], [], []>} : vector<8x16xbf16>, vector<16x32xbf16>, vector<8x32xf32> -> vector<8x32xf32>
    %217 = arith.addf %191, %216 : vector<8x32xf32>
    %218 = vector.broadcast %3 : vector<1x32xf32> to vector<8x32xf32>
    %219 = arith.addf %217, %218 : vector<8x32xf32>
    %220 = tpu.concatenate %112, %219 in 0 : vector<8x32xf32>, vector<8x32xf32> -> vector<16x32xf32>
    %c0_59 = arith.constant 0 : index
    %c0_60 = arith.constant 0 : index
    %221 = vector.load %arg6[%c0_59, %c0_60] : memref<16x32xf32, #tpu.memory_space<vmem>>, vector<16x32xf32>
    tpu.vector_store %arg6[%c0_59, %c0_60], %220 {strides = array<i32>} : memref<16x32xf32, #tpu.memory_space<vmem>>, vector<16x32xf32>,
    return
  }
  func.func @transform_0(%arg0: i32) -> (i32, i32) {
    %c0_i32 = arith.constant 0 : i32
    %c0_i32_0 = arith.constant 0 : i32
    return %arg0, %c0_i32 : i32, i32
  }
  func.func @transform_1(%arg0: i32) -> (i32, i32) {
    %c0_i32 = arith.constant 0 : i32
    %c0_i32_0 = arith.constant 0 : i32
    %c0_i32_1 = arith.constant 0 : i32
    return %c0_i32, %c0_i32_0 : i32, i32
  }
  func.func @transform_2(%arg0: i32) -> (i32, i32) {
    %c0_i32 = arith.constant 0 : i32
    %c0_i32_0 = arith.constant 0 : i32
    %c0_i32_1 = arith.constant 0 : i32
    return %c0_i32, %c0_i32_0 : i32, i32
  }
  func.func @transform_3(%arg0: i32) -> (i32, i32) {
    %c0_i32 = arith.constant 0 : i32
    %c0_i32_0 = arith.constant 0 : i32
    %c0_i32_1 = arith.constant 0 : i32
    return %c0_i32, %c0_i32_0 : i32, i32
  }
  func.func @transform_4(%arg0: i32) -> (i32, i32) {
    %c0_i32 = arith.constant 0 : i32
    %c0_i32_0 = arith.constant 0 : i32
    %c0_i32_1 = arith.constant 0 : i32
    return %c0_i32, %c0_i32_0 : i32, i32
  }
  func.func @transform_5(%arg0: i32) -> (i32, i32) {
    %c0_i32 = arith.constant 0 : i32
    %c0_i32_0 = arith.constant 0 : i32
    return %arg0, %c0_i32 : i32, i32
  }
}

</mosaic_0001>

<bundles_post_ra>
// kernel: self_attention_pallas.1
= control target key start
LH: loop header
LB: loop body
LE: loop exit
PB: predicated region body
PF: predicated region fallthrough
CT: control target
= control target key end

     0   :  { %10 = vsyncpa [#allocation3], 0  ;;  %s2272_s0 = inlined_call_operand.hbm [shape: bf16[16,32], index: 0, kind: input, shape index: {}]   ;;  %s2273_s1 = inlined_call_operand.hbm [shape: bf16[32,192], index: 1, kind: input, shape index: {}]   ;;  %s2274_s2 = inlined_call_operand.hbm [shape: bf16[64,32], index: 2, kind: input, shape index: {}]   ;;  %s2275_s3 = inlined_call_operand.hbm [shape: f32[1,32], index: 3, kind: input, shape index: {}]   ;;  %s2276_s4 = inlined_call_operand.hbm [shape: f32[8,8], index: 4, kind: input, shape index: {}]   ;;  %s2277_s5 = inlined_call_operand.hbm [shape: f32[16,32], index: 5, kind: output, shape index: {}]  }
   0x1   :  { %11 = vsyncpa [#allocation6], 0 }
   0x2   :  { %12 = vsyncpa [#allocation9], 0 }
   0x3   :  { %13 = vsyncpa [#allocation4], 0  ;;  %s1911_s18 = smov [#allocation5]   ;;  %s1771_s22 = scalar_lea.hbm %s2273_s1, 512 }
   0x4   :  { %s31_s19 = sshll.u32 %s1911_s18, 4  ;;  %p1772_p0 = scmp.ne.s32.totalorder %s2273_s1, %s1771_s22  ;;  %s32_s19 = int_to_ptr.vmem [resolvable:$true] %s31_s19 }
   0x5   :  { %p1775_p1 = scmp.lt.u32.totalorder %s1771_s22, %s2273_s1 }
   0x7   :  { %p1777_p2 = pnand %p1775_p1, %p1772_p0 }
   0x9   :  { %1780 = shalt.err (!%p1777_p2)
}
   0xa   :  { %s1781_s27 = scalar_lea.vmem %s32_s19, 512  ;;  %p1786_p4 = scmp.lt.s32.totalorder %s32_s19, %s32_s19 }
   0xb   :  { %p1782_p3 = scmp.ne.s32.totalorder %s32_s19, %s1781_s27  ;;  %p1787_p5 = scmp.lt.s32.totalorder %s1781_s27, %s1781_s27 }
   0xd   :  { %p1788_p6 = por %p1787_p5, %p1786_p4 }
   0xf   :  { %p1789_p7 = pnand %p1788_p6, %p1782_p3 }
  0x11   :  { %1792 = shalt.err (!%p1789_p7)
}
  0x12   :  { %s1912_s28 = smov 128   ;;  %s1913_s29 = smov 8  }
  0x13   :  { %37 = dma.hbm_to_vmem [thread:$0]  %s2273_s1, 512, %s32_s19, [#allocation6], %s1912_s28, %s1912_s28, %s1913_s29  }
  0x14   :  { %s1914_s7 = smov [#allocation8]   ;;  %s1915_s9 = smov [#allocation2]  }
  0x15   :  { %s56_s8 = sshll.u32 %s1914_s7, 4  ;;  %s19_s10 = sshll.u32 %s1915_s9, 4  ;;  %s57_s8 = int_to_ptr.vmem [resolvable:$true] %s56_s8  ;;  %s20_s10 = int_to_ptr.vmem [resolvable:$true] %s19_s10 }
  0x16   :  { %s1793_s13 = scalar_lea.hbm %s2275_s3, 16 }
  0x17   :  { %p1794_p8 = scmp.ne.s32.totalorder %s2275_s3, %s1793_s13  ;;  %p1797_p9 = scmp.lt.u32.totalorder %s1793_s13, %s2275_s3 }
  0x19   :  { %p1799_p10 = pnand %p1797_p9, %p1794_p8 }
  0x1b   :  { %1802 = shalt.err (!%p1799_p10)
}
  0x1c   :  { %s1803_s1 = scalar_lea.vmem %s57_s8, 16  ;;  %s1807_s18 = scalar_lea.vmem %s57_s8, 32 }
  0x1d   :  { %p1804_p11 = scmp.ne.s32.totalorder %s57_s8, %s1803_s1  ;;  %p1808_p12 = scmp.lt.s32.totalorder %s57_s8, %s57_s8 }
  0x1e   :  { %p1809_p13 = scmp.lt.s32.totalorder %s1807_s18, %s1803_s1 }
  0x20   :  { %p1810_p0 = por %p1809_p13, %p1808_p12 }
  0x22   :  { %p1811_p1 = pnand %p1810_p0, %p1804_p11 }
  0x24   :  { %1814 = shalt.err (!%p1811_p1)
}
  0x25   :  { %59 = dma.hbm_to_vmem [thread:$0]  %s2275_s3, 16, %s57_s8, [#allocation9]  }
  0x26   :  { %s1815_s23 = scalar_lea.hbm %s2272_s0, 128 }
  0x27   :  { %p1816_p2 = scmp.ne.s32.totalorder %s2272_s0, %s1815_s23  ;;  %p1819_p3 = scmp.lt.u32.totalorder %s1815_s23, %s2272_s0 }
  0x29   :  { %p1821_p4 = pnand %p1819_p3, %p1816_p2 }
  0x2b   :  { %1824 = shalt.err (!%p1821_p4)
}
  0x2c   :  { %s1825_s30 = scalar_lea.vmem %s20_s10, 128  ;;  %p1830_p6 = scmp.lt.s32.totalorder %s20_s10, %s20_s10 }
  0x2d   :  { %p1826_p5 = scmp.ne.s32.totalorder %s20_s10, %s1825_s30  ;;  %p1831_p7 = scmp.lt.s32.totalorder %s1825_s30, %s1825_s30 }
  0x2f   :  { %p1832_p8 = por %p1831_p7, %p1830_p6 }
  0x31   :  { %p1833_p9 = pnand %p1832_p8, %p1826_p5 }
  0x33   :  { %1836 = shalt.err (!%p1833_p9)
}
  0x34   :  { %s1916_s3 = smov 64   ;;  %s1917_s6 = smov 4  }
  0x35   :  { %25 = dma.hbm_to_vmem [thread:$0]  %s2272_s0, 128, %s20_s10, [#allocation3], %s1916_s3, %s1916_s3, %s1917_s6  }
  0x36   :  { %s1918_s9 = smov [#allocation7]   ;;  %s1919_s12 = smov [#allocation10]  }
  0x37   :  { %s43_s11 = sshll.u32 %s1918_s9, 4  ;;  %s66_s13 = sshll.u32 %s1919_s12, 4  ;;  %s44_s11 = int_to_ptr.vmem [resolvable:$true] %s43_s11  ;;  %s67_s13 = int_to_ptr.vmem [resolvable:$true] %s66_s13 }
  0x38   :  { %s1837_s16 = scalar_lea.hbm %s2274_s2, 512 }
  0x39   :  { %p1838_p10 = scmp.ne.s32.totalorder %s2274_s2, %s1837_s16  ;;  %p1841_p11 = scmp.lt.u32.totalorder %s1837_s16, %s2274_s2 }
  0x3b   :  { %p1843_p12 = pnand %p1841_p11, %p1838_p10 }
  0x3d   :  { %1846 = shalt.err (!%p1843_p12)
}
  0x3e   :  { %s1847_s0 = scalar_lea.vmem %s44_s11, 512  ;;  %p1852_p0 = scmp.lt.s32.totalorder %s44_s11, %s44_s11 }
  0x3f   :  { %p1848_p13 = scmp.ne.s32.totalorder %s44_s11, %s1847_s0  ;;  %p1853_p1 = scmp.lt.s32.totalorder %s1847_s0, %s1847_s0 }
  0x41   :  { %p1854_p2 = por %p1853_p1, %p1852_p0 }
  0x43   :  { %p1855_p3 = pnand %p1854_p2, %p1848_p13 }
  0x45   :  { %1858 = shalt.err (!%p1855_p3)
}
  0x46   :  { %49 = dma.hbm_to_vmem [thread:$0]  %s2274_s2, 512, %s44_s11, [#allocation6], %s1916_s3, %s1916_s3, %s1917_s6  }
  0x47   :  { %s1859_s23 = scalar_lea.hbm %s2276_s4, 128 }
  0x48   :  { %p1860_p4 = scmp.ne.s32.totalorder %s2276_s4, %s1859_s23  ;;  %p1863_p5 = scmp.lt.u32.totalorder %s1859_s23, %s2276_s4 }
  0x4a   :  { %p1865_p6 = pnand %p1863_p5, %p1860_p4 }
  0x4c   :  { %1868 = shalt.err (!%p1865_p6)
}
  0x4d   :  { %s1869_s30 = scalar_lea.vmem %s67_s13, 128  ;;  %p1874_p8 = scmp.lt.s32.totalorder %s67_s13, %s67_s13 }
  0x4e   :  { %p1870_p7 = scmp.ne.s32.totalorder %s67_s13, %s1869_s30  ;;  %p1875_p9 = scmp.lt.s32.totalorder %s1869_s30, %s1869_s30 }
  0x50   :  { %p1876_p10 = por %p1875_p9, %p1874_p8 }
  0x52   :  { %p1877_p11 = pnand %p1876_p10, %p1870_p7 }
  0x54   :  { %1880 = shalt.err (!%p1877_p11)
}
  0x55   :  { %69 = dma.hbm_to_vmem [thread:$0]  %s2276_s4, 128, %s67_s13, [#allocation9]  }
  0x56   :  { %1903 = dma.done.wait [#allocation3], 128  }
  0x57   :  { %1904 = vsyncadd [#allocation3], 4294967168 }
  0x58   :  { %1905 = dma.done.wait [#allocation6], 1024  }
  0x59   :  { %1906 = vsyncadd [#allocation6], 4294966272 }
  0x5a   :  { %1907 = dma.done.wait [#allocation9], 144  }
  0x5b   :  { %1908 = vsyncadd [#allocation9], 4294967152  ;;  %v1920_v0 = vmov 0   ;;  %v1728_v1 = vld [vmem:[#allocation5 + $0x4] ss:$8 sps:$4 sm:$0xff]   ;;  %v1734_v5 = vld [vmem:[#allocation2] sm:$0xff]  }
  0x5c   :  { %163 = vmatprep.mubr.bf16.mxu0 %v1920_v0  ;;  %v1730_v2 = vld [vmem:[#allocation5] ss:$8 sps:$4 sm:$0xff]   ;;  %131 = vmatprep.subr.bf16.mxu0 %v1728_v1  ;;  %v1731_v3 = vld [vmem:[#allocation5 + $0x14] ss:$8 sps:$4 sm:$0xff]   ;;  %v1733_v4 = vld [vmem:[#allocation5 + $0x10] ss:$8 sps:$4 sm:$0xff]  }
  0x5d   :  { %132 = vmatpush1.bf16.msra.mxu0 %v1730_v2  ;;  %vm127_vm0 = vcmask 261120   ;;  %v1921_v6 = vmov 0.0   ;;  %vm1922_vm1 = vmmov 0   ;;  %vm243_vm2 = vcmask 1043456   ;;  %s1923_s4 = smov 112   ;;  %s1924_s7 = smov 48  }
  0x5e   :  { %133 = vmatprep.subr.bf16.mxu0 %v1731_v3  ;;  %1565 = vmatprep.subr.bf16.mxu1 %v1921_v6  ;;  %vm179_vm3 = vcmask 130048   ;;  %v2062_v20 = vld [vmem:[#allocation10] sm:$0xff]  ;;  %vm228_vm4 = vcmask 64512   ;;  %s1925_s8 = smov 96   ;;  %s1926_s9 = smov 32  }
  0x5f   :  { %1567 = vmatprep.mubr.msk.bf16.mxu1 %vm1922_vm1, %v1921_v6  ;;  %s1927_s11 = smov 16   ;;  %s1928_s12 = smov 80   ;;  %v2088_v48 = vld [vmem:[#allocation7] sm:$0xff]   ;;  %v2090_v49 = vld [vmem:[#allocation7 + $0x8] sm:$0xff]  }
  0x61   :  { %134 = vmatpush1.bf16.msra.mxu0 %v1733_v4 }
  0x62   :  { %1571 = vmatprep.subr.bf16.mxu0 %v1921_v6 }
  0x64   :  { %1487 = vmatmul.mubr.msk.bf16.vlgmr.msra.gmra.mrb[0].mxu0 %vm127_vm0, %v1734_v5 }
  0x65   :  { %1573 = vmatprep.mubr.msk.bf16.mxu0 %vm1922_vm1, %v1921_v6 }
 0x137   :  { %v165_v7 = vpop.f32.mrb[0].mxu0 }
 0x138   :  { %v2034_v8 = vpack.c.bf16 %v165_v7, %v165_v7  ;;  %v167_v9 = vpop.f32.mrb[1].mxu0 }
 0x139   :  { %v2036_v10 = vpack.c.bf16 %v167_v9, %v167_v9  ;;  %v2038_v11 = vpop.f32.mrb[2].mxu0 }
 0x13a   :  { %289 = vrot.lane.b32.xlu1 %v2034_v8, %s1923_s4  ;;  %177 = vrot.lane.b32.xlu0 %v2034_v8, %s1916_s3  ;;  %v2044_v12 = vpop.f32.mrb[3].mxu0 }
 0x13b   :  { %v245_v13 = vsel %vm243_vm2, %v2036_v10, 0 }
 0x13c   :  { %1572 = vmatpush3.bf16.msra.mxu0 %v245_v13 }
 0x13d   :  { %1583 = vmatprep.subr.bf16.mxu0 %v1921_v6 }
 0x13e   :  { %291 = vrot.lane.b32.xlu0 %v2034_v8, %s1924_s7 }
 0x1ac   :  { %v178_v14 = vpop.permute.xlu0 %177  ;;  %v290_v18 = vpop.permute.xlu1 %289 }
 0x1ad   :  { %v184_v15 = vsel %vm179_vm3, %v178_v14, 0 }
 0x1ae   :  { %1566 = vmatpush3.bf16.xpose.msra.mxu1 %v184_v15 }
 0x1af   :  { %1577 = vmatprep.subr.bf16.mxu1 %v1921_v6 }
 0x1b0   :  { %v292_v16 = vpop.permute.xlu0 %291 }
 0x1b1   :  { %v297_v17 = vsel %vm179_vm3, %v292_v16, 0 }
 0x1b5   :  { %1568 = vmatmul.mubr.msk.bf16.vlgmr.msra.gmra.mrb[0].mxu1 %vm179_vm3, %v2034_v8 }
 0x1b6   :  { %1578 = vmatpush3.bf16.xpose.msra.mxu1 %v297_v17  ;;  %1579 = vmatprep.mubr.msk.bf16.mxu1 %vm1922_vm1, %v1921_v6 }
 0x1b7   :  { %1589 = vmatprep.subr.bf16.mxu1 %v1921_v6 }
 0x1bd   :  { %1580 = vmatmul.mubr.msk.bf16.vlgmr.msra.gmra.mrb[4].mxu1 %vm179_vm3, %v290_v18 }
 0x1be   :  { %1591 = vmatprep.mubr.msk.bf16.mxu1 %vm1922_vm1, %v1921_v6  ;;  %1590 = vmatpush3.bf16.msra.mxu1 %v2090_v49 }
 0x1bf   :  { %1601 = vmatprep.subr.bf16.mxu1 %v1921_v6 }
 0x288   :  { %v220_v19 = vpop.f32.mrb[0].mxu1 }
 0x289   :  { %v226_v21 = vmul.f32 0.0625, %v220_v19  ;;  %v1569_v22 = vpop.f32.mrb[1].mxu1 }
 0x28a   :  { %v223_v23 = vpop.f32.mrb[2].mxu1 }
 0x28b   :  { %v1570_v24 = vpop.f32.mrb[3].mxu1  ;;  %v227_v25 = vadd.f32 %v226_v21, %v2062_v20 }
 0x28d   :  { %v229_v26 = vsel %vm228_vm4, %v227_v25, -inf }
 0x28e   :  { %230 = vmax.xlane.f32.xlu1 %v229_v26 }
 0x290   :  { %v333_v27 = vpop.f32.mrb[4].mxu1 }
 0x291   :  { %v339_v28 = vmul.f32 0.0625, %v333_v27  ;;  %v1581_v29 = vpop.f32.mrb[5].mxu1 }
 0x292   :  { %v336_v30 = vpop.f32.mrb[6].mxu1 }
 0x293   :  { %v1582_v31 = vpop.f32.mrb[7].mxu1  ;;  %v340_v32 = vadd.f32 %v339_v28, %v2062_v20 }
 0x295   :  { %v341_v33 = vsel %vm228_vm4, %v340_v32, -inf }
 0x296   :  { %342 = vmax.xlane.f32.xlu0 %v341_v33 }
 0x2ac   :  { %353 = vrot.lane.b32.xlu0 %v2036_v10, %s1923_s4 }
 0x2b0   :  { %501 = vrot.lane.b32.xlu0 %v2034_v8, %s1925_s8 }
 0x31b   :  { %v231_v34 = vpop.xlane.xlu1 %230 }
 0x31c   :  { %v232_v35 = vsub.f32 %v227_v25, %v231_v34 }
 0x31e   :  { %v233_v36 = vmul.f32 1.442695, %v232_v35 }
 0x320   :  { %1739 = vpow2.f32 %v233_v36 }
 0x323   :  { %v343_v37 = vpop.xlane.xlu0 %342 }
 0x324   :  { %v344_v38 = vsub.f32 %v340_v32, %v343_v37  ;;  %v2128_v37 = vpack.c.bf16 %v2038_v11, %v2038_v11 }
 0x326   :  { %v345_v39 = vmul.f32 1.442695, %v344_v38  ;;  %v2132_v38 = vld [vmem:[#allocation7 + $0x10] sm:$0xff]  }
 0x327   :  { %v354_v41 = vpop.permute.xlu0 %353 }
 0x328   :  { %1741 = vpow2.f32 %v345_v39  ;;  %v359_v43 = vsel %vm243_vm2, %v354_v41, 0 }
 0x32a   :  { %v1740_v40 = vpop.eup %1739 }
 0x32b   :  { %v239_v42 = vpack.c.bf16 %v1740_v40, %v1740_v40  ;;  %v235_v47 = vsel %vm228_vm4, %v1740_v40, 0.0  ;;  %v502_v4 = vpop.permute.xlu0 %501 }
 0x32d   :  { %1574 = vmatmul.mubr.msk.bf16.vlgmr.msra.gmra.mrb[4].mxu0 %vm228_vm4, %v239_v42 }
 0x32e   :  { %1584 = vmatpush3.bf16.msra.mxu0 %v359_v43  ;;  %1585 = vmatprep.mubr.msk.bf16.mxu0 %vm1922_vm1, %v1921_v6 }
 0x32f   :  { %1595 = vmatprep.subr.bf16.mxu0 %v1921_v6 }
 0x332   :  { %v1742_v44 = vpop.eup %1741 }
 0x333   :  { %v347_v45 = vsel %vm228_vm4, %v1742_v44, 0.0  ;;  %v351_v46 = vpack.c.bf16 %v1742_v44, %v1742_v44 }
 0x334   :  { %348 = vadd.xlane.f32.xlu1 %v347_v45 }
 0x335   :  { %1586 = vmatmul.mubr.msk.bf16.vlgmr.msra.gmra.mrb[8].mxu0 %vm228_vm4, %v351_v46 }
 0x336   :  { %1597 = vmatprep.mubr.msk.bf16.mxu0 %vm1922_vm1, %v1921_v6  ;;  %1596 = vmatpush3.bf16.msra.mxu0 %v2088_v48 }
 0x337   :  { %1607 = vmatprep.subr.bf16.mxu0 %v1921_v6 }
 0x345   :  { %503 = vrot.lane.b32.xlu1 %v2034_v8, %s1926_s9 }
 0x369   :  { %236 = vadd.xlane.f32.xlu1 %v235_v47 }
 0x37a   :  { %666 = vrot.lane.b32.xlu1 %v2034_v8, %s1927_s11 }
 0x37e   :  { %664 = vrot.lane.b32.xlu1 %v2034_v8, %s1928_s12 }
 0x3c1   :  { %v349_v50 = vpop.xlane.xlu1 %348 }
 0x3c5   :  { %v504_v51 = vpop.permute.xlu1 %503 }
 0x3c6   :  { %v509_v3 = vsel %vm179_vm3, %v504_v51, 0 }
 0x3f6   :  { %v237_v52 = vpop.xlane.xlu1 %236 }
 0x3f7   :  { %1743 = vrcp.f32 %v237_v52 }
 0x3f8   :  { %1745 = vrcp.f32 %v349_v50 }
 0x3fa   :  { %v667_v32 = vpop.permute.xlu1 %666 }
 0x3fb   :  { %v672_v35 = vsel %vm179_vm3, %v667_v32, 0 }
 0x3fe   :  { %v665_v36 = vpop.permute.xlu1 %664 }
 0x400   :  { %v281_v53 = vpop.f32.mrb[4].mxu0 }
 0x401   :  { %v1744_v54 = vpop.eup %1743  ;;  %v1575_v55 = vpop.f32.mrb[5].mxu0 }
 0x402   :  { %v287_v56 = vmul.f32 %v1744_v54, %v281_v53  ;;  %v284_v57 = vpop.f32.mrb[6].mxu0  ;;  %v1746_v60 = vpop.eup %1745 }
 0x403   :  { %v1576_v58 = vpop.f32.mrb[7].mxu0 }
 0x404   :  { %v288_v59 = vpack.c.bf16 %v287_v56, %v287_v56 }
 0x406   :  { %1598 = vmatmul.mubr.msk.bf16.vlgmr.msra.gmra.mrb[12].mxu0 %vm179_vm3, %v288_v59 }
 0x407   :  { %1609 = vmatprep.mubr.msk.bf16.mxu0 %vm1922_vm1, %v1921_v6 }
 0x408   :  { %v395_v61 = vpop.f32.mrb[8].mxu0 }
 0x409   :  { %v401_v62 = vmul.f32 %v1746_v60, %v395_v61  ;;  %v1587_v63 = vpop.f32.mrb[9].mxu0 }
 0x40a   :  { %v398_v0 = vpop.f32.mrb[10].mxu0 }
 0x40b   :  { %v402_v1 = vpack.c.bf16 %v401_v62, %v401_v62  ;;  %v1588_v2 = vpop.f32.mrb[11].mxu0 }
 0x40d   :  { %1592 = vmatmul.mubr.msk.bf16.vlgmr.msra.gmra.mrb[8].mxu1 %vm179_vm3, %v402_v1 }
 0x40e   :  { %1602 = vmatpush3.bf16.xpose.msra.mxu1 %v509_v3  ;;  %1603 = vmatprep.mubr.msk.bf16.mxu1 %vm1922_vm1, %v1921_v6 }
 0x40f   :  { %1613 = vmatprep.subr.bf16.mxu1 %v1921_v6 }
 0x415   :  { %1604 = vmatmul.mubr.msk.bf16.vlgmr.msra.gmra.mrb[12].mxu1 %vm179_vm3, %v502_v4 }
 0x416   :  { %1615 = vmatprep.mubr.msk.bf16.mxu1 %vm1922_vm1, %v1921_v6  ;;  %1614 = vmatpush3.bf16.msra.mxu1 %v2132_v38 }
 0x417   :  { %1625 = vmatprep.subr.bf16.mxu1 %v1921_v6 }
 0x4d9   :  { %v495_v5 = vpop.f32.mrb[12].mxu0 }
 0x4da   :  { %v1599_v7 = vpop.f32.mrb[13].mxu0 }
 0x4db   :  { %v498_v8 = vpop.f32.mrb[14].mxu0 }
 0x4dc   :  { %v1600_v9 = vpop.f32.mrb[15].mxu0 }
 0x4dd   :  { %v2167_v9 = vld [vmem:[#allocation7 + $0x18] sm:$0xff]  }
 0x4e0   :  { %v446_v13 = vpop.f32.mrb[8].mxu1 }
 0x4e1   :  { %v2107_v14 = vadd.f32 %v495_v5, %v446_v13  ;;  %v1593_v15 = vpop.f32.mrb[9].mxu1 }
 0x4e2   :  { %v449_v16 = vpop.f32.mrb[10].mxu1 }
 0x4e3   :  { %v1594_v17 = vpop.f32.mrb[11].mxu1  ;;  %v2173_v16 = vpack.c.bf16 %v2044_v12, %v2044_v12 }
 0x4e8   :  { %v545_v18 = vpop.f32.mrb[12].mxu1 }
 0x4e9   :  { %v551_v19 = vmul.f32 0.0625, %v545_v18  ;;  %v1605_v21 = vpop.f32.mrb[13].mxu1 }
 0x4ea   :  { %v548_v22 = vpop.f32.mrb[14].mxu1 }
 0x4eb   :  { %v1606_v23 = vpop.f32.mrb[15].mxu1  ;;  %v552_v24 = vadd.f32 %v551_v19, %v2062_v20  ;;  %v902_v22 = vsel %vm243_vm2, %v2173_v16, 0 }
 0x4ed   :  { %v553_v25 = vsel %vm228_vm4, %v552_v24, -inf }
 0x4ee   :  { %554 = vmax.xlane.f32.xlu0 %v553_v25 }
 0x504   :  { %564 = vrot.lane.b32.xlu0 %v2036_v10, %s1925_s8 }
 0x57b   :  { %v555_v26 = vpop.xlane.xlu0 %554 }
 0x57c   :  { %v556_v27 = vsub.f32 %v552_v24, %v555_v26 }
 0x57e   :  { %v557_v28 = vmul.f32 1.442695, %v556_v27 }
 0x57f   :  { %v565_v29 = vpop.permute.xlu0 %564 }
 0x580   :  { %1747 = vpow2.f32 %v557_v28  ;;  %v570_v30 = vsel %vm243_vm2, %v565_v29, 0 }
 0x581   :  { %1608 = vmatpush3.bf16.msra.mxu0 %v570_v30 }
 0x582   :  { %1619 = vmatprep.subr.bf16.mxu0 %v1921_v6 }
 0x58a   :  { %v1748_v31 = vpop.eup %1747 }
 0x58b   :  { %v559_v33 = vsel %vm228_vm4, %v1748_v31, 0.0  ;;  %v563_v34 = vpack.c.bf16 %v1748_v31, %v1748_v31 }
 0x58c   :  { %560 = vadd.xlane.f32.xlu0 %v559_v33 }
 0x58d   :  { %1610 = vmatmul.mubr.msk.bf16.vlgmr.msra.gmra.mrb[16].mxu0 %vm228_vm4, %v563_v34 }
 0x58e   :  { %1620 = vmatpush3.bf16.xpose.msra.mxu0 %v672_v35  ;;  %1621 = vmatprep.mubr.msk.bf16.mxu0 %vm1922_vm1, %v1921_v6 }
 0x58f   :  { %1631 = vmatprep.subr.bf16.mxu0 %v1921_v6 }
 0x595   :  { %1622 = vmatmul.mubr.msk.bf16.vlgmr.msra.gmra.mrb[20].mxu0 %vm179_vm3, %v665_v36 }
 0x596   :  { %1633 = vmatprep.mubr.msk.bf16.mxu0 %vm1922_vm1, %v1921_v6  ;;  %1632 = vmatpush3.bf16.msra.mxu0 %v2167_v9 }
 0x597   :  { %1643 = vmatprep.subr.bf16.mxu0 %v1921_v6 }
 0x5a2   :  { %727 = vrot.lane.b32.xlu0 %v2036_v10, %s1928_s12 }
 0x5a6   :  { %948 = vrot.lane.b32.xlu0 %v2128_v37, %s1924_s7 }
 0x619   :  { %v561_v39 = vpop.xlane.xlu0 %560 }
 0x61a   :  { %1749 = vrcp.f32 %v561_v39 }
 0x61d   :  { %v728_v10 = vpop.permute.xlu0 %727 }
 0x61e   :  { %v733_v46 = vsel %vm243_vm2, %v728_v10, 0 }
 0x621   :  { %v949_v0 = vpop.permute.xlu0 %948 }
 0x622   :  { %v954_v1 = vsel %vm179_vm3, %v949_v0, 0 }
 0x624   :  { %v1750_v40 = vpop.eup %1749 }
 0x660   :  { %v606_v41 = vpop.f32.mrb[16].mxu0 }
 0x661   :  { %v612_v42 = vmul.f32 %v1750_v40, %v606_v41  ;;  %v1611_v43 = vpop.f32.mrb[17].mxu0 }
 0x662   :  { %v609_v44 = vpop.f32.mrb[18].mxu0 }
 0x663   :  { %v613_v45 = vpack.c.bf16 %v612_v42, %v612_v42  ;;  %v1612_v11 = vpop.f32.mrb[19].mxu0 }
 0x665   :  { %1616 = vmatmul.mubr.msk.bf16.vlgmr.msra.gmra.mrb[16].mxu1 %vm179_vm3, %v613_v45 }
 0x666   :  { %1626 = vmatpush3.bf16.msra.mxu1 %v733_v46  ;;  %1627 = vmatprep.mubr.msk.bf16.mxu1 %vm1922_vm1, %v1921_v6 }
 0x667   :  { %1637 = vmatprep.subr.bf16.mxu1 %v1921_v6 }
 0x668   :  { %v708_v47 = vpop.f32.mrb[20].mxu0 }
 0x669   :  { %v714_v50 = vmul.f32 0.0625, %v708_v47  ;;  %v1623_v51 = vpop.f32.mrb[21].mxu0 }
 0x66a   :  { %v711_v52 = vpop.f32.mrb[22].mxu0  ;;  %v2202_v51 = vld [vmem:[#allocation8] ss:$0 sm:$0xff] }
 0x66b   :  { %v1624_v53 = vpop.f32.mrb[23].mxu0  ;;  %v715_v54 = vadd.f32 %v714_v50, %v2062_v20 }
 0x66d   :  { %v716_v55 = vsel %vm228_vm4, %v715_v54, -inf }
 0x66e   :  { %717 = vmax.xlane.f32.xlu1 %v716_v55 }
 0x67f   :  { %837 = vrot.lane.b32.xlu1 %v2128_v37, %s1916_s3  ;;  %s1929_s3 = smov [#allocation11]  }
 0x680   :  { %s1468_s13 = sshll.u32 %s1929_s3, 4  ;;  %s1469_s13 = int_to_ptr.vmem [resolvable:$true] %s1468_s13 }
 0x681   :  { %s1881_s14 = scalar_lea.vmem %s1469_s13, 256  ;;  %p1886_p13 = scmp.lt.s32.totalorder %s1469_s13, %s1469_s13 }
 0x682   :  { %p1882_p12 = scmp.ne.s32.totalorder %s1469_s13, %s1881_s14  ;;  %p1887_p0 = scmp.lt.s32.totalorder %s1881_s14, %s1881_s14 }
 0x683   :  { %946 = vrot.lane.b32.xlu1 %v2128_v37, %s1923_s4 }
 0x684   :  { %p1888_p1 = por %p1887_p0, %p1886_p13 }
 0x686   :  { %p1889_p2 = pnand %p1888_p1, %p1882_p12 }
 0x6fb   :  { %v718_v56 = vpop.xlane.xlu1 %717 }
 0x6fc   :  { %v719_v57 = vsub.f32 %v715_v54, %v718_v56 }
 0x6fe   :  { %v720_v58 = vmul.f32 1.442695, %v719_v57 }
 0x6ff   :  { %v838_v60 = vpop.permute.xlu1 %837 }
 0x700   :  { %1751 = vpow2.f32 %v720_v58  ;;  %v843_v63 = vsel %vm179_vm3, %v838_v60, 0 }
 0x703   :  { %v947_v2 = vpop.permute.xlu1 %946 }
 0x70a   :  { %v1752_v59 = vpop.eup %1751 }
 0x70b   :  { %v722_v61 = vsel %vm228_vm4, %v1752_v59, 0.0  ;;  %v726_v62 = vpack.c.bf16 %v1752_v59, %v1752_v59 }
 0x70c   :  { %723 = vadd.xlane.f32.xlu0 %v722_v61 }
 0x70d   :  { %1628 = vmatmul.mubr.msk.bf16.vlgmr.msra.gmra.mrb[20].mxu1 %vm228_vm4, %v726_v62 }
 0x70e   :  { %1638 = vmatpush3.bf16.xpose.msra.mxu1 %v843_v63  ;;  %1639 = vmatprep.mubr.msk.bf16.mxu1 %vm1922_vm1, %v1921_v6 }
 0x70f   :  { %1649 = vmatprep.subr.bf16.mxu1 %v1921_v6 }
 0x715   :  { %1640 = vmatmul.mubr.msk.bf16.vlgmr.msra.gmra.mrb[24].mxu1 %vm179_vm3, %v2128_v37 }
 0x716   :  { %1650 = vmatpush3.bf16.xpose.msra.mxu1 %v954_v1  ;;  %1651 = vmatprep.mubr.msk.bf16.mxu1 %vm1922_vm1, %v1921_v6 }
 0x717   :  { %1661 = vmatprep.subr.bf16.mxu1 %v1921_v6 }
 0x71d   :  { %1652 = vmatmul.mubr.msk.bf16.vlgmr.msra.gmra.mrb[28].mxu1 %vm179_vm3, %v947_v2 }
 0x71e   :  { %1662 = vmatpush3.bf16.msra.mxu1 %v2090_v49  ;;  %1663 = vmatprep.mubr.msk.bf16.mxu1 %vm1922_vm1, %v1921_v6 }
 0x71f   :  { %1673 = vmatprep.subr.bf16.mxu1 %v1921_v6 }
 0x738   :  { %v657_v3 = vpop.f32.mrb[16].mxu1 }
 0x739   :  { %v2165_v4 = vadd.f32 %v657_v3, %v2107_v14  ;;  %v1617_v5 = vpop.f32.mrb[17].mxu1 }
 0x73a   :  { %v660_v7 = vpop.f32.mrb[18].mxu1 }
 0x73b   :  { %v1618_v8 = vpop.f32.mrb[19].mxu1 }
 0x799   :  { %v724_v13 = vpop.xlane.xlu0 %723 }
 0x79a   :  { %1753 = vrcp.f32 %v724_v13 }
 0x7a4   :  { %v1754_v49 = vpop.eup %1753 }
 0x7e0   :  { %v769_v15 = vpop.f32.mrb[20].mxu1 }
 0x7e1   :  { %v775_v17 = vmul.f32 %v1754_v49, %v769_v15  ;;  %v1629_v14 = vpop.f32.mrb[21].mxu1 }
 0x7e2   :  { %v772_v18 = vpop.f32.mrb[22].mxu1 }
 0x7e3   :  { %v776_v19 = vpack.c.bf16 %v775_v17, %v775_v17  ;;  %v1630_v21 = vpop.f32.mrb[23].mxu1 }
 0x7e5   :  { %1634 = vmatmul.mubr.msk.bf16.vlgmr.msra.gmra.mrb[24].mxu0 %vm179_vm3, %v776_v19 }
 0x7e6   :  { %1644 = vmatpush3.bf16.msra.mxu0 %v902_v22  ;;  %1645 = vmatprep.mubr.msk.bf16.mxu0 %vm1922_vm1, %v1921_v6 }
 0x7e7   :  { %1655 = vmatprep.subr.bf16.mxu0 %v1921_v6 }
 0x7e8   :  { %v879_v23 = vpop.f32.mrb[24].mxu1 }
 0x7e9   :  { %v885_v24 = vmul.f32 0.0625, %v879_v23  ;;  %v1641_v12 = vpop.f32.mrb[25].mxu1 }
 0x7ea   :  { %v882_v25 = vpop.f32.mrb[26].mxu1 }
 0x7eb   :  { %v1642_v26 = vpop.f32.mrb[27].mxu1  ;;  %v886_v27 = vadd.f32 %v885_v24, %v2062_v20 }
 0x7ed   :  { %v887_v28 = vsel %vm228_vm4, %v886_v27, -inf }
 0x7ee   :  { %888 = vmax.xlane.f32.xlu1 %v887_v28 }
 0x7f0   :  { %v990_v29 = vpop.f32.mrb[28].mxu1 }
 0x7f1   :  { %v996_v30 = vmul.f32 0.0625, %v990_v29  ;;  %v1653_v31 = vpop.f32.mrb[29].mxu1 }
 0x7f2   :  { %v993_v32 = vpop.f32.mrb[30].mxu1 }
 0x7f3   :  { %v1654_v33 = vpop.f32.mrb[31].mxu1  ;;  %v997_v34 = vadd.f32 %v996_v30, %v2062_v20 }
 0x7f5   :  { %v998_v35 = vsel %vm228_vm4, %v997_v34, -inf }
 0x7f6   :  { %999 = vmax.xlane.f32.xlu0 %v998_v35 }
 0x80c   :  { %1010 = vrot.lane.b32.xlu0 %v2173_v16, %s1923_s4 }
 0x810   :  { %1146 = vrot.lane.b32.xlu0 %v2128_v37, %s1925_s8 }
 0x87b   :  { %v889_v36 = vpop.xlane.xlu1 %888 }
 0x87c   :  { %v890_v39 = vsub.f32 %v886_v27, %v889_v36 }
 0x87e   :  { %v891_v40 = vmul.f32 1.442695, %v890_v39 }
 0x880   :  { %1755 = vpow2.f32 %v891_v40 }
 0x883   :  { %v1000_v41 = vpop.xlane.xlu0 %999 }
 0x884   :  { %v1001_v42 = vsub.f32 %v997_v34, %v1000_v41 }
 0x886   :  { %v1002_v43 = vmul.f32 1.442695, %v1001_v42 }
 0x887   :  { %v1011_v44 = vpop.permute.xlu0 %1010 }
 0x888   :  { %1757 = vpow2.f32 %v1002_v43  ;;  %v1016_v11 = vsel %vm243_vm2, %v1011_v44, 0 }
 0x88a   :  { %v1756_v10 = vpop.eup %1755 }
 0x88b   :  { %v897_v45 = vpack.c.bf16 %v1756_v10, %v1756_v10  ;;  %v1147_v17 = vpop.permute.xlu0 %1146 }
 0x88d   :  { %1646 = vmatmul.mubr.msk.bf16.vlgmr.msra.gmra.mrb[28].mxu0 %vm228_vm4, %v897_v45 }
 0x88e   :  { %1656 = vmatpush3.bf16.msra.mxu0 %v1016_v11  ;;  %1657 = vmatprep.mubr.msk.bf16.mxu0 %vm1922_vm1, %v1921_v6 }
 0x88f   :  { %1667 = vmatprep.subr.bf16.mxu0 %v1921_v6 }
 0x892   :  { %v1758_v46 = vpop.eup %1757 }
 0x893   :  { %v1004_v47 = vsel %vm228_vm4, %v1758_v46, 0.0  ;;  %v1008_v50 = vpack.c.bf16 %v1758_v46, %v1758_v46 }
 0x894   :  { %1005 = vadd.xlane.f32.xlu1 %v1004_v47 }
 0x895   :  { %1658 = vmatmul.mubr.msk.bf16.vlgmr.msra.gmra.mrb[32].mxu0 %vm228_vm4, %v1008_v50 }
 0x896   :  { %1668 = vmatpush3.bf16.msra.mxu0 %v2088_v48  ;;  %1669 = vmatprep.mubr.msk.bf16.mxu0 %vm1922_vm1, %v1921_v6  ;;  %v893_v48 = vsel %vm228_vm4, %v1756_v10, 0.0 }
 0x897   :  { %1679 = vmatprep.subr.bf16.mxu0 %v1921_v6 }
 0x8a5   :  { %1148 = vrot.lane.b32.xlu1 %v2128_v37, %s1926_s9 }
 0x8b8   :  { %v820_v52 = vpop.f32.mrb[24].mxu0 }
 0x8b9   :  { %v826_v53 = vadd.f32 %v820_v52, %v2165_v4  ;;  %v1635_v54 = vpop.f32.mrb[25].mxu0 }
 0x8ba   :  { %v823_v55 = vpop.f32.mrb[26].mxu0 }
 0x8bb   :  { %v833_v56 = vadd.f32 %v2202_v51, %v826_v53  ;;  %v1636_v57 = vpop.f32.mrb[27].mxu0 }
 0x8bd   :  { %1461 = vst.msk [vmem:[#allocation11] sm:$0xff] %vm127_vm0, %v833_v56 }
 0x8c9   :  { %894 = vadd.xlane.f32.xlu1 %v893_v48 }
 0x8da   :  { %1305 = vrot.lane.b32.xlu1 %v2128_v37, %s1927_s11 }
 0x8de   :  { %1303 = vrot.lane.b32.xlu1 %v2128_v37, %s1928_s12 }
 0x921   :  { %v1006_v58 = vpop.xlane.xlu1 %1005 }
 0x925   :  { %v1149_v59 = vpop.permute.xlu1 %1148 }
 0x926   :  { %v1154_v15 = vsel %vm179_vm3, %v1149_v59, 0 }
 0x956   :  { %v895_v60 = vpop.xlane.xlu1 %894 }
 0x957   :  { %1759 = vrcp.f32 %v895_v60 }
 0x958   :  { %1761 = vrcp.f32 %v1006_v58 }
 0x95a   :  { %v1306_v40 = vpop.permute.xlu1 %1305 }
 0x95b   :  { %v1311_v43 = vsel %vm179_vm3, %v1306_v40, 0 }
 0x95e   :  { %v1304_v10 = vpop.permute.xlu1 %1303 }
 0x960   :  { %v938_v61 = vpop.f32.mrb[28].mxu0 }
 0x961   :  { %v1760_v62 = vpop.eup %1759  ;;  %v1647_v63 = vpop.f32.mrb[29].mxu0 }
 0x962   :  { %v944_v0 = vmul.f32 %v1760_v62, %v938_v61  ;;  %v941_v1 = vpop.f32.mrb[30].mxu0  ;;  %v1762_v4 = vpop.eup %1761 }
 0x963   :  { %v1648_v2 = vpop.f32.mrb[31].mxu0 }
 0x964   :  { %v945_v3 = vpack.c.bf16 %v944_v0, %v944_v0 }
 0x966   :  { %1670 = vmatmul.mubr.msk.bf16.vlgmr.msra.gmra.mrb[36].mxu0 %vm179_vm3, %v945_v3 }
 0x967   :  { %1681 = vmatprep.mubr.msk.bf16.mxu0 %vm1922_vm1, %v1921_v6 }
 0x968   :  { %v1052_v5 = vpop.f32.mrb[32].mxu0 }
 0x969   :  { %v1058_v37 = vmul.f32 %v1762_v4, %v1052_v5  ;;  %v1659_v7 = vpop.f32.mrb[33].mxu0 }
 0x96a   :  { %v1055_v8 = vpop.f32.mrb[34].mxu0 }
 0x96b   :  { %v1059_v13 = vpack.c.bf16 %v1058_v37, %v1058_v37  ;;  %v1660_v49 = vpop.f32.mrb[35].mxu0 }
 0x96d   :  { %1664 = vmatmul.mubr.msk.bf16.vlgmr.msra.gmra.mrb[32].mxu1 %vm179_vm3, %v1059_v13 }
 0x96e   :  { %1674 = vmatpush3.bf16.xpose.msra.mxu1 %v1154_v15  ;;  %1675 = vmatprep.mubr.msk.bf16.mxu1 %vm1922_vm1, %v1921_v6 }
 0x96f   :  { %1685 = vmatprep.subr.bf16.mxu1 %v1921_v6 }
 0x975   :  { %1676 = vmatmul.mubr.msk.bf16.vlgmr.msra.gmra.mrb[36].mxu1 %vm179_vm3, %v1147_v17 }
 0x976   :  { %1686 = vmatpush3.bf16.msra.mxu1 %v2132_v38  ;;  %1687 = vmatprep.mubr.msk.bf16.mxu1 %vm1922_vm1, %v1921_v6 }
 0x977   :  { %1697 = vmatprep.subr.bf16.mxu1 %v1921_v6 }
 0xa39   :  { %v1140_v14 = vpop.f32.mrb[36].mxu0 }
 0xa3a   :  { %v1671_v18 = vpop.f32.mrb[37].mxu0 }
 0xa3b   :  { %v1143_v19 = vpop.f32.mrb[38].mxu0 }
 0xa3c   :  { %v1672_v21 = vpop.f32.mrb[39].mxu0 }
 0xa40   :  { %v1097_v22 = vpop.f32.mrb[32].mxu1 }
 0xa41   :  { %v2225_v23 = vadd.f32 %v1140_v14, %v1097_v22  ;;  %v1665_v24 = vpop.f32.mrb[33].mxu1 }
 0xa42   :  { %v1100_v12 = vpop.f32.mrb[34].mxu1 }
 0xa43   :  { %v1666_v25 = vpop.f32.mrb[35].mxu1 }
 0xa48   :  { %v1190_v26 = vpop.f32.mrb[36].mxu1 }
 0xa49   :  { %v1196_v27 = vmul.f32 0.0625, %v1190_v26  ;;  %v1677_v28 = vpop.f32.mrb[37].mxu1 }
 0xa4a   :  { %v1193_v29 = vpop.f32.mrb[38].mxu1 }
 0xa4b   :  { %v1678_v38 = vpop.f32.mrb[39].mxu1  ;;  %v1197_v30 = vadd.f32 %v1196_v27, %v2062_v20 }
 0xa4d   :  { %v1198_v31 = vsel %vm228_vm4, %v1197_v30, -inf }
 0xa4e   :  { %1199 = vmax.xlane.f32.xlu0 %v1198_v31 }
 0xa64   :  { %1209 = vrot.lane.b32.xlu0 %v2173_v16, %s1925_s8 }
 0xadb   :  { %v1200_v32 = vpop.xlane.xlu0 %1199 }
 0xadc   :  { %v1201_v33 = vsub.f32 %v1197_v30, %v1200_v32 }
 0xade   :  { %v1202_v34 = vmul.f32 1.442695, %v1201_v33 }
 0xadf   :  { %v1210_v35 = vpop.permute.xlu0 %1209 }
 0xae0   :  { %1763 = vpow2.f32 %v1202_v34  ;;  %v1215_v36 = vsel %vm243_vm2, %v1210_v35, 0 }
 0xae1   :  { %1680 = vmatpush3.bf16.msra.mxu0 %v1215_v36 }
 0xae2   :  { %1691 = vmatprep.subr.bf16.mxu0 %v1921_v6 }
 0xaea   :  { %v1764_v39 = vpop.eup %1763 }
 0xaeb   :  { %v1204_v41 = vsel %vm228_vm4, %v1764_v39, 0.0  ;;  %v1208_v42 = vpack.c.bf16 %v1764_v39, %v1764_v39 }
 0xaec   :  { %1205 = vadd.xlane.f32.xlu0 %v1204_v41 }
 0xaed   :  { %1682 = vmatmul.mubr.msk.bf16.vlgmr.msra.gmra.mrb[40].mxu0 %vm228_vm4, %v1208_v42 }
 0xaee   :  { %1692 = vmatpush3.bf16.xpose.msra.mxu0 %v1311_v43  ;;  %1693 = vmatprep.mubr.msk.bf16.mxu0 %vm1922_vm1, %v1921_v6 }
 0xaef   :  { %1703 = vmatprep.subr.bf16.mxu0 %v1921_v6 }
 0xaf5   :  { %1694 = vmatmul.mubr.msk.bf16.vlgmr.msra.gmra.mrb[44].mxu0 %vm179_vm3, %v1304_v10 }
 0xaf6   :  { %1704 = vmatpush3.bf16.msra.mxu0 %v2167_v9  ;;  %1705 = vmatprep.mubr.msk.bf16.mxu0 %vm1922_vm1, %v1921_v6 }
 0xb02   :  { %1366 = vrot.lane.b32.xlu0 %v2173_v16, %s1928_s12 }
 0xb79   :  { %v1206_v44 = vpop.xlane.xlu0 %1205 }
 0xb7a   :  { %1765 = vrcp.f32 %v1206_v44 }
 0xb7d   :  { %v1367_v50 = vpop.permute.xlu0 %1366 }
 0xb7e   :  { %v1372_v55 = vsel %vm243_vm2, %v1367_v50, 0 }
 0xb84   :  { %v1766_v45 = vpop.eup %1765 }
 0xbc0   :  { %v1251_v11 = vpop.f32.mrb[40].mxu0 }
 0xbc1   :  { %v1257_v46 = vmul.f32 %v1766_v45, %v1251_v11  ;;  %v1683_v47 = vpop.f32.mrb[41].mxu0 }
 0xbc2   :  { %v1254_v52 = vpop.f32.mrb[42].mxu0 }
 0xbc3   :  { %v1258_v53 = vpack.c.bf16 %v1257_v46, %v1257_v46  ;;  %v1684_v54 = vpop.f32.mrb[43].mxu0 }
 0xbc5   :  { %1688 = vmatmul.mubr.msk.bf16.vlgmr.msra.gmra.mrb[40].mxu1 %vm179_vm3, %v1258_v53 }
 0xbc6   :  { %1698 = vmatpush3.bf16.msra.mxu1 %v1372_v55  ;;  %1699 = vmatprep.mubr.msk.bf16.mxu1 %vm1922_vm1, %v1921_v6 }
 0xbc8   :  { %v1347_v9 = vpop.f32.mrb[44].mxu0 }
 0xbc9   :  { %v1353_v16 = vmul.f32 0.0625, %v1347_v9  ;;  %v1695_v56 = vpop.f32.mrb[45].mxu0 }
 0xbca   :  { %v1350_v57 = vpop.f32.mrb[46].mxu0 }
 0xbcb   :  { %v1696_v48 = vpop.f32.mrb[47].mxu0  ;;  %v1354_v58 = vadd.f32 %v1353_v16, %v2062_v20 }
 0xbcd   :  { %v1355_v59 = vsel %vm228_vm4, %v1354_v58, -inf }
 0xbce   :  { %1356 = vmax.xlane.f32.xlu1 %v1355_v59 }
 0xc5b   :  { %v1357_v60 = vpop.xlane.xlu1 %1356 }
 0xc5c   :  { %v1358_v61 = vsub.f32 %v1354_v58, %v1357_v60 }
 0xc5e   :  { %v1359_v62 = vmul.f32 1.442695, %v1358_v61 }
 0xc60   :  { %1767 = vpow2.f32 %v1359_v62 }
 0xc6a   :  { %v1768_v63 = vpop.eup %1767 }
 0xc6b   :  { %v1361_v0 = vsel %vm228_vm4, %v1768_v63, 0.0  ;;  %v1365_v1 = vpack.c.bf16 %v1768_v63, %v1768_v63 }
 0xc6c   :  { %1362 = vadd.xlane.f32.xlu1 %v1361_v0 }
 0xc6d   :  { %1700 = vmatmul.mubr.msk.bf16.vlgmr.msra.gmra.mrb[44].mxu1 %vm228_vm4, %v1365_v1 }
 0xc98   :  { %v1296_v6 = vpop.f32.mrb[40].mxu1 }
 0xc99   :  { %v1302_v2 = vadd.f32 %v1296_v6, %v2225_v23  ;;  %v1689_v3 = vpop.f32.mrb[41].mxu1 }
 0xc9a   :  { %v1299_v4 = vpop.f32.mrb[42].mxu1 }
 0xc9b   :  { %v1690_v20 = vpop.f32.mrb[43].mxu1 }
 0xcf9   :  { %v1363_v5 = vpop.xlane.xlu1 %1362 }
 0xcfa   :  { %1769 = vrcp.f32 %v1363_v5 }
 0xd04   :  { %v1770_v37 = vpop.eup %1769 }
 0xd40   :  { %v1408_v7 = vpop.f32.mrb[44].mxu1 }
 0xd41   :  { %v1414_v8 = vmul.f32 %v1770_v37, %v1408_v7  ;;  %v1701_v13 = vpop.f32.mrb[45].mxu1 }
 0xd42   :  { %v1411_v49 = vpop.f32.mrb[46].mxu1 }
 0xd43   :  { %v1415_v15 = vpack.c.bf16 %v1414_v8, %v1414_v8  ;;  %v1702_v17 = vpop.f32.mrb[47].mxu1 }
 0xd45   :  { %1706 = vmatmul.mubr.msk.bf16.vlgmr.msra.gmra.mrb[48].mxu0 %vm179_vm3, %v1415_v15 }
 0xe18   :  { %v1453_v14 = vpop.f32.mrb[48].mxu0 }
 0xe19   :  { %v1459_v18 = vadd.f32 %v1453_v14, %v1302_v2  ;;  %v1707_v19 = vpop.f32.mrb[49].mxu0 }
 0xe1a   :  { %v1456_v21 = vpop.f32.mrb[50].mxu0 }
 0xe1b   :  { %v1460_v22 = vadd.f32 %v2202_v51, %v1459_v18  ;;  %v1708_v23 = vpop.f32.mrb[51].mxu0 }
 0xe1d   :  { %1462 = vst.msk [vmem:[#allocation11 + $0x8] sm:$0xff] %vm127_vm0, %v1460_v22 }
 0xe1e   :  { %1892 = shalt.err (!%p1889_p2)
}
 0xe1f   :  { %s1893_s17 = scalar_lea.hbm %s2277_s5, 256 }
 0xe20   :  { %p1894_p3 = scmp.ne.s32.totalorder %s2277_s5, %s1893_s17  ;;  %p1897_p4 = scmp.lt.u32.totalorder %s1893_s17, %s2277_s5 }
 0xe22   :  { %p1899_p5 = pnand %p1897_p4, %p1894_p3 }
 0xe24   :  { %1902 = shalt.err (!%p1899_p5)
}
 0xe25   :  { %1474 = dma.vmem_to_hbm [thread:$0]  %s1469_s13, 256, %s2277_s5, [#allocation4], %s1912_s28, %s1912_s28, %s1913_s29  }
 0xe26   :  { %1909 = dma.done.wait [#allocation4], 256  }
 0xe27   :  { %1910 = vsyncadd [#allocation4], 4294967040 }
 0xe28   :  { %1478 = vsyncpa [#allocation3], 1 }
 0xe29   :  { %1479 = vsyncpa [#allocation6], 1 }
 0xe2a   :  { %1480 = vsyncpa [#allocation9], 1 }
 0xe2b   :  { %1481 = vsyncpa [#allocation4], 1 }

// kernel: self_attention_pallas.1
= control target key start
LH: loop header
LB: loop body
LE: loop exit
PB: predicated region body
PF: predicated region fallthrough
CT: control target
= control target key end

     0   :  { %10 = vsyncpa [#allocation3], 0  ;;  %s2272_s0 = inlined_call_operand.hbm [shape: bf16[16,32], index: 0, kind: input, shape index: {}]   ;;  %s2273_s1 = inlined_call_operand.hbm [shape: bf16[32,192], index: 1, kind: input, shape index: {}]   ;;  %s2274_s2 = inlined_call_operand.hbm [shape: bf16[64,32], index: 2, kind: input, shape index: {}]   ;;  %s2275_s3 = inlined_call_operand.hbm [shape: f32[1,32], index: 3, kind: input, shape index: {}]   ;;  %s2276_s4 = inlined_call_operand.hbm [shape: f32[8,8], index: 4, kind: input, shape index: {}]   ;;  %s2277_s5 = inlined_call_operand.hbm [shape: f32[16,32], index: 5, kind: output, shape index: {}]  }
   0x1   :  { %11 = vsyncpa [#allocation6], 0 }
   0x2   :  { %12 = vsyncpa [#allocation9], 0 }
   0x3   :  { %13 = vsyncpa [#allocation4], 0  ;;  %s1911_s18 = smov [#allocation5]   ;;  %s1771_s22 = scalar_lea.hbm %s2273_s1, 512 }
   0x4   :  { %s31_s19 = sshll.u32 %s1911_s18, 4  ;;  %p1772_p0 = scmp.ne.s32.totalorder %s2273_s1, %s1771_s22  ;;  %s32_s19 = int_to_ptr.vmem [resolvable:$true] %s31_s19 }
   0x5   :  { %p1775_p1 = scmp.lt.u32.totalorder %s1771_s22, %s2273_s1 }
   0x7   :  { %p1777_p2 = pnand %p1775_p1, %p1772_p0 }
   0x9   :  { %1780 = shalt.err (!%p1777_p2)
}
   0xa   :  { %s1781_s27 = scalar_lea.vmem %s32_s19, 512  ;;  %p1786_p4 = scmp.lt.s32.totalorder %s32_s19, %s32_s19 }
   0xb   :  { %p1782_p3 = scmp.ne.s32.totalorder %s32_s19, %s1781_s27  ;;  %p1787_p5 = scmp.lt.s32.totalorder %s1781_s27, %s1781_s27 }
   0xd   :  { %p1788_p6 = por %p1787_p5, %p1786_p4 }
   0xf   :  { %p1789_p7 = pnand %p1788_p6, %p1782_p3 }
  0x11   :  { %1792 = shalt.err (!%p1789_p7)
}
  0x12   :  { %s1912_s28 = smov 128   ;;  %s1913_s29 = smov 8  }
  0x13   :  { %37 = dma.hbm_to_vmem [thread:$0]  %s2273_s1, 512, %s32_s19, [#allocation6], %s1912_s28, %s1912_s28, %s1913_s29  }
  0x14   :  { %s1914_s7 = smov [#allocation8]   ;;  %s1915_s9 = smov [#allocation2]  }
  0x15   :  { %s56_s8 = sshll.u32 %s1914_s7, 4  ;;  %s19_s10 = sshll.u32 %s1915_s9, 4  ;;  %s57_s8 = int_to_ptr.vmem [resolvable:$true] %s56_s8  ;;  %s20_s10 = int_to_ptr.vmem [resolvable:$true] %s19_s10 }
  0x16   :  { %s1793_s13 = scalar_lea.hbm %s2275_s3, 16 }
  0x17   :  { %p1794_p8 = scmp.ne.s32.totalorder %s2275_s3, %s1793_s13  ;;  %p1797_p9 = scmp.lt.u32.totalorder %s1793_s13, %s2275_s3 }
  0x19   :  { %p1799_p10 = pnand %p1797_p9, %p1794_p8 }
  0x1b   :  { %1802 = shalt.err (!%p1799_p10)
}
  0x1c   :  { %s1803_s1 = scalar_lea.vmem %s57_s8, 16  ;;  %s1807_s18 = scalar_lea.vmem %s57_s8, 32 }
  0x1d   :  { %p1804_p11 = scmp.ne.s32.totalorder %s57_s8, %s1803_s1  ;;  %p1808_p12 = scmp.lt.s32.totalorder %s57_s8, %s57_s8 }
  0x1e   :  { %p1809_p13 = scmp.lt.s32.totalorder %s1807_s18, %s1803_s1 }
  0x20   :  { %p1810_p0 = por %p1809_p13, %p1808_p12 }
  0x22   :  { %p1811_p1 = pnand %p1810_p0, %p1804_p11 }
  0x24   :  { %1814 = shalt.err (!%p1811_p1)
}
  0x25   :  { %59 = dma.hbm_to_vmem [thread:$0]  %s2275_s3, 16, %s57_s8, [#allocation9]  }
  0x26   :  { %s1815_s23 = scalar_lea.hbm %s2272_s0, 128 }
  0x27   :  { %p1816_p2 = scmp.ne.s32.totalorder %s2272_s0, %s1815_s23  ;;  %p1819_p3 = scmp.lt.u32.totalorder %s1815_s23, %s2272_s0 }
  0x29   :  { %p1821_p4 = pnand %p1819_p3, %p1816_p2 }
  0x2b   :  { %1824 = shalt.err (!%p1821_p4)
}
  0x2c   :  { %s1825_s30 = scalar_lea.vmem %s20_s10, 128  ;;  %p1830_p6 = scmp.lt.s32.totalorder %s20_s10, %s20_s10 }
  0x2d   :  { %p1826_p5 = scmp.ne.s32.totalorder %s20_s10, %s1825_s30  ;;  %p1831_p7 = scmp.lt.s32.totalorder %s1825_s30, %s1825_s30 }
  0x2f   :  { %p1832_p8 = por %p1831_p7, %p1830_p6 }
  0x31   :  { %p1833_p9 = pnand %p1832_p8, %p1826_p5 }
  0x33   :  { %1836 = shalt.err (!%p1833_p9)
}
  0x34   :  { %s1916_s3 = smov 64   ;;  %s1917_s6 = smov 4  }
  0x35   :  { %25 = dma.hbm_to_vmem [thread:$0]  %s2272_s0, 128, %s20_s10, [#allocation3], %s1916_s3, %s1916_s3, %s1917_s6  }
  0x36   :  { %s1918_s9 = smov [#allocation7]   ;;  %s1919_s12 = smov [#allocation10]  }
  0x37   :  { %s43_s11 = sshll.u32 %s1918_s9, 4  ;;  %s66_s13 = sshll.u32 %s1919_s12, 4  ;;  %s44_s11 = int_to_ptr.vmem [resolvable:$true] %s43_s11  ;;  %s67_s13 = int_to_ptr.vmem [resolvable:$true] %s66_s13 }
  0x38   :  { %s1837_s16 = scalar_lea.hbm %s2274_s2, 512 }
  0x39   :  { %p1838_p10 = scmp.ne.s32.totalorder %s2274_s2, %s1837_s16  ;;  %p1841_p11 = scmp.lt.u32.totalorder %s1837_s16, %s2274_s2 }
  0x3b   :  { %p1843_p12 = pnand %p1841_p11, %p1838_p10 }
  0x3d   :  { %1846 = shalt.err (!%p1843_p12)
}
  0x3e   :  { %s1847_s0 = scalar_lea.vmem %s44_s11, 512  ;;  %p1852_p0 = scmp.lt.s32.totalorder %s44_s11, %s44_s11 }
  0x3f   :  { %p1848_p13 = scmp.ne.s32.totalorder %s44_s11, %s1847_s0  ;;  %p1853_p1 = scmp.lt.s32.totalorder %s1847_s0, %s1847_s0 }
  0x41   :  { %p1854_p2 = por %p1853_p1, %p1852_p0 }
  0x43   :  { %p1855_p3 = pnand %p1854_p2, %p1848_p13 }
  0x45   :  { %1858 = shalt.err (!%p1855_p3)
}
  0x46   :  { %49 = dma.hbm_to_vmem [thread:$0]  %s2274_s2, 512, %s44_s11, [#allocation6], %s1916_s3, %s1916_s3, %s1917_s6  }
  0x47   :  { %s1859_s23 = scalar_lea.hbm %s2276_s4, 128 }
  0x48   :  { %p1860_p4 = scmp.ne.s32.totalorder %s2276_s4, %s1859_s23  ;;  %p1863_p5 = scmp.lt.u32.totalorder %s1859_s23, %s2276_s4 }
  0x4a   :  { %p1865_p6 = pnand %p1863_p5, %p1860_p4 }
  0x4c   :  { %1868 = shalt.err (!%p1865_p6)
}
  0x4d   :  { %s1869_s30 = scalar_lea.vmem %s67_s13, 128  ;;  %p1874_p8 = scmp.lt.s32.totalorder %s67_s13, %s67_s13 }
  0x4e   :  { %p1870_p7 = scmp.ne.s32.totalorder %s67_s13, %s1869_s30  ;;  %p1875_p9 = scmp.lt.s32.totalorder %s1869_s30, %s1869_s30 }
  0x50   :  { %p1876_p10 = por %p1875_p9, %p1874_p8 }
  0x52   :  { %p1877_p11 = pnand %p1876_p10, %p1870_p7 }
  0x54   :  { %1880 = shalt.err (!%p1877_p11)
}
  0x55   :  { %69 = dma.hbm_to_vmem [thread:$0]  %s2276_s4, 128, %s67_s13, [#allocation9]  }
  0x56   :  { %1903 = dma.done.wait [#allocation3], 128  }
  0x57   :  { %1904 = vsyncadd [#allocation3], 4294967168 }
  0x58   :  { %1905 = dma.done.wait [#allocation6], 1024  }
  0x59   :  { %1906 = vsyncadd [#allocation6], 4294966272 }
  0x5a   :  { %1907 = dma.done.wait [#allocation9], 144  }
  0x5b   :  { %1908 = vsyncadd [#allocation9], 4294967152  ;;  %v1920_v0 = vmov 0   ;;  %v1728_v1 = vld [vmem:[#allocation5 + $0x4] ss:$8 sps:$4 sm:$0xff]   ;;  %v1734_v5 = vld [vmem:[#allocation2] sm:$0xff]  }
  0x5c   :  { %163 = vmatprep.mubr.bf16.mxu0 %v1920_v0  ;;  %v1730_v2 = vld [vmem:[#allocation5] ss:$8 sps:$4 sm:$0xff]   ;;  %131 = vmatprep.subr.bf16.mxu0 %v1728_v1  ;;  %v1731_v3 = vld [vmem:[#allocation5 + $0x14] ss:$8 sps:$4 sm:$0xff]   ;;  %v1733_v4 = vld [vmem:[#allocation5 + $0x10] ss:$8 sps:$4 sm:$0xff]  }
  0x5d   :  { %132 = vmatpush1.bf16.msra.mxu0 %v1730_v2  ;;  %vm127_vm0 = vcmask 261120   ;;  %v1921_v6 = vmov 0.0   ;;  %vm1922_vm1 = vmmov 0   ;;  %vm243_vm2 = vcmask 1043456   ;;  %s1923_s4 = smov 112   ;;  %s1924_s7 = smov 48  }
  0x5e   :  { %133 = vmatprep.subr.bf16.mxu0 %v1731_v3  ;;  %1565 = vmatprep.subr.bf16.mxu1 %v1921_v6  ;;  %vm179_vm3 = vcmask 130048   ;;  %v2062_v20 = vld [vmem:[#allocation10] sm:$0xff]  ;;  %vm228_vm4 = vcmask 64512   ;;  %s1925_s8 = smov 96   ;;  %s1926_s9 = smov 32  }
  0x5f   :  { %1567 = vmatprep.mubr.msk.bf16.mxu1 %vm1922_vm1, %v1921_v6  ;;  %s1927_s11 = smov 16   ;;  %s1928_s12 = smov 80   ;;  %v2088_v48 = vld [vmem:[#allocation7] sm:$0xff]   ;;  %v2090_v49 = vld [vmem:[#allocation7 + $0x8] sm:$0xff]  }
  0x61   :  { %134 = vmatpush1.bf16.msra.mxu0 %v1733_v4 }
  0x62   :  { %1571 = vmatprep.subr.bf16.mxu0 %v1921_v6 }
  0x64   :  { %1487 = vmatmul.mubr.msk.bf16.vlgmr.msra.gmra.mrb[0].mxu0 %vm127_vm0, %v1734_v5 }
  0x65   :  { %1573 = vmatprep.mubr.msk.bf16.mxu0 %vm1922_vm1, %v1921_v6 }
 0x137   :  { %v165_v7 = vpop.f32.mrb[0].mxu0 }
 0x138   :  { %v2034_v8 = vpack.c.bf16 %v165_v7, %v165_v7  ;;  %v167_v9 = vpop.f32.mrb[1].mxu0 }
 0x139   :  { %v2036_v10 = vpack.c.bf16 %v167_v9, %v167_v9  ;;  %v2038_v11 = vpop.f32.mrb[2].mxu0 }
 0x13a   :  { %289 = vrot.lane.b32.xlu1 %v2034_v8, %s1923_s4  ;;  %177 = vrot.lane.b32.xlu0 %v2034_v8, %s1916_s3  ;;  %v2044_v12 = vpop.f32.mrb[3].mxu0 }
 0x13b   :  { %v245_v13 = vsel %vm243_vm2, %v2036_v10, 0 }
 0x13c   :  { %1572 = vmatpush3.bf16.msra.mxu0 %v245_v13 }
 0x13d   :  { %1583 = vmatprep.subr.bf16.mxu0 %v1921_v6 }
 0x13e   :  { %291 = vrot.lane.b32.xlu0 %v2034_v8, %s1924_s7 }
 0x1ac   :  { %v178_v14 = vpop.permute.xlu0 %177  ;;  %v290_v18 = vpop.permute.xlu1 %289 }
 0x1ad   :  { %v184_v15 = vsel %vm179_vm3, %v178_v14, 0 }
 0x1ae   :  { %1566 = vmatpush3.bf16.xpose.msra.mxu1 %v184_v15 }
 0x1af   :  { %1577 = vmatprep.subr.bf16.mxu1 %v1921_v6 }
 0x1b0   :  { %v292_v16 = vpop.permute.xlu0 %291 }
 0x1b1   :  { %v297_v17 = vsel %vm179_vm3, %v292_v16, 0 }
 0x1b5   :  { %1568 = vmatmul.mubr.msk.bf16.vlgmr.msra.gmra.mrb[0].mxu1 %vm179_vm3, %v2034_v8 }
 0x1b6   :  { %1578 = vmatpush3.bf16.xpose.msra.mxu1 %v297_v17  ;;  %1579 = vmatprep.mubr.msk.bf16.mxu1 %vm1922_vm1, %v1921_v6 }
 0x1b7   :  { %1589 = vmatprep.subr.bf16.mxu1 %v1921_v6 }
 0x1bd   :  { %1580 = vmatmul.mubr.msk.bf16.vlgmr.msra.gmra.mrb[4].mxu1 %vm179_vm3, %v290_v18 }
 0x1be   :  { %1591 = vmatprep.mubr.msk.bf16.mxu1 %vm1922_vm1, %v1921_v6  ;;  %1590 = vmatpush3.bf16.msra.mxu1 %v2090_v49 }
 0x1bf   :  { %1601 = vmatprep.subr.bf16.mxu1 %v1921_v6 }
 0x288   :  { %v220_v19 = vpop.f32.mrb[0].mxu1 }
 0x289   :  { %v226_v21 = vmul.f32 0.0625, %v220_v19  ;;  %v1569_v22 = vpop.f32.mrb[1].mxu1 }
 0x28a   :  { %v223_v23 = vpop.f32.mrb[2].mxu1 }
 0x28b   :  { %v1570_v24 = vpop.f32.mrb[3].mxu1  ;;  %v227_v25 = vadd.f32 %v226_v21, %v2062_v20 }
 0x28d   :  { %v229_v26 = vsel %vm228_vm4, %v227_v25, -inf }
 0x28e   :  { %230 = vmax.xlane.f32.xlu1 %v229_v26 }
 0x290   :  { %v333_v27 = vpop.f32.mrb[4].mxu1 }
 0x291   :  { %v339_v28 = vmul.f32 0.0625, %v333_v27  ;;  %v1581_v29 = vpop.f32.mrb[5].mxu1 }
 0x292   :  { %v336_v30 = vpop.f32.mrb[6].mxu1 }
 0x293   :  { %v1582_v31 = vpop.f32.mrb[7].mxu1  ;;  %v340_v32 = vadd.f32 %v339_v28, %v2062_v20 }
 0x295   :  { %v341_v33 = vsel %vm228_vm4, %v340_v32, -inf }
 0x296   :  { %342 = vmax.xlane.f32.xlu0 %v341_v33 }
 0x2ac   :  { %353 = vrot.lane.b32.xlu0 %v2036_v10, %s1923_s4 }
 0x2b0   :  { %501 = vrot.lane.b32.xlu0 %v2034_v8, %s1925_s8 }
 0x31b   :  { %v231_v34 = vpop.xlane.xlu1 %230 }
 0x31c   :  { %v232_v35 = vsub.f32 %v227_v25, %v231_v34 }
 0x31e   :  { %v233_v36 = vmul.f32 1.442695, %v232_v35 }
 0x320   :  { %1739 = vpow2.f32 %v233_v36 }
 0x323   :  { %v343_v37 = vpop.xlane.xlu0 %342 }
 0x324   :  { %v344_v38 = vsub.f32 %v340_v32, %v343_v37  ;;  %v2128_v37 = vpack.c.bf16 %v2038_v11, %v2038_v11 }
 0x326   :  { %v345_v39 = vmul.f32 1.442695, %v344_v38  ;;  %v2132_v38 = vld [vmem:[#allocation7 + $0x10] sm:$0xff]  }
 0x327   :  { %v354_v41 = vpop.permute.xlu0 %353 }
 0x328   :  { %1741 = vpow2.f32 %v345_v39  ;;  %v359_v43 = vsel %vm243_vm2, %v354_v41, 0 }
 0x32a   :  { %v1740_v40 = vpop.eup %1739 }
 0x32b   :  { %v239_v42 = vpack.c.bf16 %v1740_v40, %v1740_v40  ;;  %v235_v47 = vsel %vm228_vm4, %v1740_v40, 0.0  ;;  %v502_v4 = vpop.permute.xlu0 %501 }
 0x32d   :  { %1574 = vmatmul.mubr.msk.bf16.vlgmr.msra.gmra.mrb[4].mxu0 %vm228_vm4, %v239_v42 }
 0x32e   :  { %1584 = vmatpush3.bf16.msra.mxu0 %v359_v43  ;;  %1585 = vmatprep.mubr.msk.bf16.mxu0 %vm1922_vm1, %v1921_v6 }
 0x32f   :  { %1595 = vmatprep.subr.bf16.mxu0 %v1921_v6 }
 0x332   :  { %v1742_v44 = vpop.eup %1741 }
 0x333   :  { %v347_v45 = vsel %vm228_vm4, %v1742_v44, 0.0  ;;  %v351_v46 = vpack.c.bf16 %v1742_v44, %v1742_v44 }
 0x334   :  { %348 = vadd.xlane.f32.xlu1 %v347_v45 }
 0x335   :  { %1586 = vmatmul.mubr.msk.bf16.vlgmr.msra.gmra.mrb[8].mxu0 %vm228_vm4, %v351_v46 }
 0x336   :  { %1597 = vmatprep.mubr.msk.bf16.mxu0 %vm1922_vm1, %v1921_v6  ;;  %1596 = vmatpush3.bf16.msra.mxu0 %v2088_v48 }
 0x337   :  { %1607 = vmatprep.subr.bf16.mxu0 %v1921_v6 }
 0x345   :  { %503 = vrot.lane.b32.xlu1 %v2034_v8, %s1926_s9 }
 0x369   :  { %236 = vadd.xlane.f32.xlu1 %v235_v47 }
 0x37a   :  { %666 = vrot.lane.b32.xlu1 %v2034_v8, %s1927_s11 }
 0x37e   :  { %664 = vrot.lane.b32.xlu1 %v2034_v8, %s1928_s12 }
 0x3c1   :  { %v349_v50 = vpop.xlane.xlu1 %348 }
 0x3c5   :  { %v504_v51 = vpop.permute.xlu1 %503 }
 0x3c6   :  { %v509_v3 = vsel %vm179_vm3, %v504_v51, 0 }
 0x3f6   :  { %v237_v52 = vpop.xlane.xlu1 %236 }
 0x3f7   :  { %1743 = vrcp.f32 %v237_v52 }
 0x3f8   :  { %1745 = vrcp.f32 %v349_v50 }
 0x3fa   :  { %v667_v32 = vpop.permute.xlu1 %666 }
 0x3fb   :  { %v672_v35 = vsel %vm179_vm3, %v667_v32, 0 }
 0x3fe   :  { %v665_v36 = vpop.permute.xlu1 %664 }
 0x400   :  { %v281_v53 = vpop.f32.mrb[4].mxu0 }
 0x401   :  { %v1744_v54 = vpop.eup %1743  ;;  %v1575_v55 = vpop.f32.mrb[5].mxu0 }
 0x402   :  { %v287_v56 = vmul.f32 %v1744_v54, %v281_v53  ;;  %v284_v57 = vpop.f32.mrb[6].mxu0  ;;  %v1746_v60 = vpop.eup %1745 }
 0x403   :  { %v1576_v58 = vpop.f32.mrb[7].mxu0 }
 0x404   :  { %v288_v59 = vpack.c.bf16 %v287_v56, %v287_v56 }
 0x406   :  { %1598 = vmatmul.mubr.msk.bf16.vlgmr.msra.gmra.mrb[12].mxu0 %vm179_vm3, %v288_v59 }
 0x407   :  { %1609 = vmatprep.mubr.msk.bf16.mxu0 %vm1922_vm1, %v1921_v6 }
 0x408   :  { %v395_v61 = vpop.f32.mrb[8].mxu0 }
 0x409   :  { %v401_v62 = vmul.f32 %v1746_v60, %v395_v61  ;;  %v1587_v63 = vpop.f32.mrb[9].mxu0 }
 0x40a   :  { %v398_v0 = vpop.f32.mrb[10].mxu0 }
 0x40b   :  { %v402_v1 = vpack.c.bf16 %v401_v62, %v401_v62  ;;  %v1588_v2 = vpop.f32.mrb[11].mxu0 }
 0x40d   :  { %1592 = vmatmul.mubr.msk.bf16.vlgmr.msra.gmra.mrb[8].mxu1 %vm179_vm3, %v402_v1 }
 0x40e   :  { %1602 = vmatpush3.bf16.xpose.msra.mxu1 %v509_v3  ;;  %1603 = vmatprep.mubr.msk.bf16.mxu1 %vm1922_vm1, %v1921_v6 }
 0x40f   :  { %1613 = vmatprep.subr.bf16.mxu1 %v1921_v6 }
 0x415   :  { %1604 = vmatmul.mubr.msk.bf16.vlgmr.msra.gmra.mrb[12].mxu1 %vm179_vm3, %v502_v4 }
 0x416   :  { %1615 = vmatprep.mubr.msk.bf16.mxu1 %vm1922_vm1, %v1921_v6  ;;  %1614 = vmatpush3.bf16.msra.mxu1 %v2132_v38 }
 0x417   :  { %1625 = vmatprep.subr.bf16.mxu1 %v1921_v6 }
 0x4d9   :  { %v495_v5 = vpop.f32.mrb[12].mxu0 }
 0x4da   :  { %v1599_v7 = vpop.f32.mrb[13].mxu0 }
 0x4db   :  { %v498_v8 = vpop.f32.mrb[14].mxu0 }
 0x4dc   :  { %v1600_v9 = vpop.f32.mrb[15].mxu0 }
 0x4dd   :  { %v2167_v9 = vld [vmem:[#allocation7 + $0x18] sm:$0xff]  }
 0x4e0   :  { %v446_v13 = vpop.f32.mrb[8].mxu1 }
 0x4e1   :  { %v2107_v14 = vadd.f32 %v495_v5, %v446_v13  ;;  %v1593_v15 = vpop.f32.mrb[9].mxu1 }
 0x4e2   :  { %v449_v16 = vpop.f32.mrb[10].mxu1 }
 0x4e3   :  { %v1594_v17 = vpop.f32.mrb[11].mxu1  ;;  %v2173_v16 = vpack.c.bf16 %v2044_v12, %v2044_v12 }
 0x4e8   :  { %v545_v18 = vpop.f32.mrb[12].mxu1 }
 0x4e9   :  { %v551_v19 = vmul.f32 0.0625, %v545_v18  ;;  %v1605_v21 = vpop.f32.mrb[13].mxu1 }
 0x4ea   :  { %v548_v22 = vpop.f32.mrb[14].mxu1 }
 0x4eb   :  { %v1606_v23 = vpop.f32.mrb[15].mxu1  ;;  %v552_v24 = vadd.f32 %v551_v19, %v2062_v20  ;;  %v902_v22 = vsel %vm243_vm2, %v2173_v16, 0 }
 0x4ed   :  { %v553_v25 = vsel %vm228_vm4, %v552_v24, -inf }
 0x4ee   :  { %554 = vmax.xlane.f32.xlu0 %v553_v25 }
 0x504   :  { %564 = vrot.lane.b32.xlu0 %v2036_v10, %s1925_s8 }
 0x57b   :  { %v555_v26 = vpop.xlane.xlu0 %554 }
 0x57c   :  { %v556_v27 = vsub.f32 %v552_v24, %v555_v26 }
 0x57e   :  { %v557_v28 = vmul.f32 1.442695, %v556_v27 }
 0x57f   :  { %v565_v29 = vpop.permute.xlu0 %564 }
 0x580   :  { %1747 = vpow2.f32 %v557_v28  ;;  %v570_v30 = vsel %vm243_vm2, %v565_v29, 0 }
 0x581   :  { %1608 = vmatpush3.bf16.msra.mxu0 %v570_v30 }
 0x582   :  { %1619 = vmatprep.subr.bf16.mxu0 %v1921_v6 }
 0x58a   :  { %v1748_v31 = vpop.eup %1747 }
 0x58b   :  { %v559_v33 = vsel %vm228_vm4, %v1748_v31, 0.0  ;;  %v563_v34 = vpack.c.bf16 %v1748_v31, %v1748_v31 }
 0x58c   :  { %560 = vadd.xlane.f32.xlu0 %v559_v33 }
 0x58d   :  { %1610 = vmatmul.mubr.msk.bf16.vlgmr.msra.gmra.mrb[16].mxu0 %vm228_vm4, %v563_v34 }
 0x58e   :  { %1620 = vmatpush3.bf16.xpose.msra.mxu0 %v672_v35  ;;  %1621 = vmatprep.mubr.msk.bf16.mxu0 %vm1922_vm1, %v1921_v6 }
 0x58f   :  { %1631 = vmatprep.subr.bf16.mxu0 %v1921_v6 }
 0x595   :  { %1622 = vmatmul.mubr.msk.bf16.vlgmr.msra.gmra.mrb[20].mxu0 %vm179_vm3, %v665_v36 }
 0x596   :  { %1633 = vmatprep.mubr.msk.bf16.mxu0 %vm1922_vm1, %v1921_v6  ;;  %1632 = vmatpush3.bf16.msra.mxu0 %v2167_v9 }
 0x597   :  { %1643 = vmatprep.subr.bf16.mxu0 %v1921_v6 }
 0x5a2   :  { %727 = vrot.lane.b32.xlu0 %v2036_v10, %s1928_s12 }
 0x5a6   :  { %948 = vrot.lane.b32.xlu0 %v2128_v37, %s1924_s7 }
 0x619   :  { %v561_v39 = vpop.xlane.xlu0 %560 }
 0x61a   :  { %1749 = vrcp.f32 %v561_v39 }
 0x61d   :  { %v728_v10 = vpop.permute.xlu0 %727 }
 0x61e   :  { %v733_v46 = vsel %vm243_vm2, %v728_v10, 0 }
 0x621   :  { %v949_v0 = vpop.permute.xlu0 %948 }
 0x622   :  { %v954_v1 = vsel %vm179_vm3, %v949_v0, 0 }
 0x624   :  { %v1750_v40 = vpop.eup %1749 }
 0x660   :  { %v606_v41 = vpop.f32.mrb[16].mxu0 }
 0x661   :  { %v612_v42 = vmul.f32 %v1750_v40, %v606_v41  ;;  %v1611_v43 = vpop.f32.mrb[17].mxu0 }
 0x662   :  { %v609_v44 = vpop.f32.mrb[18].mxu0 }
 0x663   :  { %v613_v45 = vpack.c.bf16 %v612_v42, %v612_v42  ;;  %v1612_v11 = vpop.f32.mrb[19].mxu0 }
 0x665   :  { %1616 = vmatmul.mubr.msk.bf16.vlgmr.msra.gmra.mrb[16].mxu1 %vm179_vm3, %v613_v45 }
 0x666   :  { %1626 = vmatpush3.bf16.msra.mxu1 %v733_v46  ;;  %1627 = vmatprep.mubr.msk.bf16.mxu1 %vm1922_vm1, %v1921_v6 }
 0x667   :  { %1637 = vmatprep.subr.bf16.mxu1 %v1921_v6 }
 0x668   :  { %v708_v47 = vpop.f32.mrb[20].mxu0 }
 0x669   :  { %v714_v50 = vmul.f32 0.0625, %v708_v47  ;;  %v1623_v51 = vpop.f32.mrb[21].mxu0 }
 0x66a   :  { %v711_v52 = vpop.f32.mrb[22].mxu0  ;;  %v2202_v51 = vld [vmem:[#allocation8] ss:$0 sm:$0xff] }
 0x66b   :  { %v1624_v53 = vpop.f32.mrb[23].mxu0  ;;  %v715_v54 = vadd.f32 %v714_v50, %v2062_v20 }
 0x66d   :  { %v716_v55 = vsel %vm228_vm4, %v715_v54, -inf }
 0x66e   :  { %717 = vmax.xlane.f32.xlu1 %v716_v55 }
 0x67f   :  { %837 = vrot.lane.b32.xlu1 %v2128_v37, %s1916_s3  ;;  %s1929_s3 = smov [#allocation11]  }
 0x680   :  { %s1468_s13 = sshll.u32 %s1929_s3, 4  ;;  %s1469_s13 = int_to_ptr.vmem [resolvable:$true] %s1468_s13 }
 0x681   :  { %s1881_s14 = scalar_lea.vmem %s1469_s13, 256  ;;  %p1886_p13 = scmp.lt.s32.totalorder %s1469_s13, %s1469_s13 }
 0x682   :  { %p1882_p12 = scmp.ne.s32.totalorder %s1469_s13, %s1881_s14  ;;  %p1887_p0 = scmp.lt.s32.totalorder %s1881_s14, %s1881_s14 }
 0x683   :  { %946 = vrot.lane.b32.xlu1 %v2128_v37, %s1923_s4 }
 0x684   :  { %p1888_p1 = por %p1887_p0, %p1886_p13 }
 0x686   :  { %p1889_p2 = pnand %p1888_p1, %p1882_p12 }
 0x6fb   :  { %v718_v56 = vpop.xlane.xlu1 %717 }
 0x6fc   :  { %v719_v57 = vsub.f32 %v715_v54, %v718_v56 }
 0x6fe   :  { %v720_v58 = vmul.f32 1.442695, %v719_v57 }
 0x6ff   :  { %v838_v60 = vpop.permute.xlu1 %837 }
 0x700   :  { %1751 = vpow2.f32 %v720_v58  ;;  %v843_v63 = vsel %vm179_vm3, %v838_v60, 0 }
 0x703   :  { %v947_v2 = vpop.permute.xlu1 %946 }
 0x70a   :  { %v1752_v59 = vpop.eup %1751 }
 0x70b   :  { %v722_v61 = vsel %vm228_vm4, %v1752_v59, 0.0  ;;  %v726_v62 = vpack.c.bf16 %v1752_v59, %v1752_v59 }
 0x70c   :  { %723 = vadd.xlane.f32.xlu0 %v722_v61 }
 0x70d   :  { %1628 = vmatmul.mubr.msk.bf16.vlgmr.msra.gmra.mrb[20].mxu1 %vm228_vm4, %v726_v62 }
 0x70e   :  { %1638 = vmatpush3.bf16.xpose.msra.mxu1 %v843_v63  ;;  %1639 = vmatprep.mubr.msk.bf16.mxu1 %vm1922_vm1, %v1921_v6 }
 0x70f   :  { %1649 = vmatprep.subr.bf16.mxu1 %v1921_v6 }
 0x715   :  { %1640 = vmatmul.mubr.msk.bf16.vlgmr.msra.gmra.mrb[24].mxu1 %vm179_vm3, %v2128_v37 }
 0x716   :  { %1650 = vmatpush3.bf16.xpose.msra.mxu1 %v954_v1  ;;  %1651 = vmatprep.mubr.msk.bf16.mxu1 %vm1922_vm1, %v1921_v6 }
 0x717   :  { %1661 = vmatprep.subr.bf16.mxu1 %v1921_v6 }
 0x71d   :  { %1652 = vmatmul.mubr.msk.bf16.vlgmr.msra.gmra.mrb[28].mxu1 %vm179_vm3, %v947_v2 }
 0x71e   :  { %1662 = vmatpush3.bf16.msra.mxu1 %v2090_v49  ;;  %1663 = vmatprep.mubr.msk.bf16.mxu1 %vm1922_vm1, %v1921_v6 }
 0x71f   :  { %1673 = vmatprep.subr.bf16.mxu1 %v1921_v6 }
 0x738   :  { %v657_v3 = vpop.f32.mrb[16].mxu1 }
 0x739   :  { %v2165_v4 = vadd.f32 %v657_v3, %v2107_v14  ;;  %v1617_v5 = vpop.f32.mrb[17].mxu1 }
 0x73a   :  { %v660_v7 = vpop.f32.mrb[18].mxu1 }
 0x73b   :  { %v1618_v8 = vpop.f32.mrb[19].mxu1 }
 0x799   :  { %v724_v13 = vpop.xlane.xlu0 %723 }
 0x79a   :  { %1753 = vrcp.f32 %v724_v13 }
 0x7a4   :  { %v1754_v49 = vpop.eup %1753 }
 0x7e0   :  { %v769_v15 = vpop.f32.mrb[20].mxu1 }
 0x7e1   :  { %v775_v17 = vmul.f32 %v1754_v49, %v769_v15  ;;  %v1629_v14 = vpop.f32.mrb[21].mxu1 }
 0x7e2   :  { %v772_v18 = vpop.f32.mrb[22].mxu1 }
 0x7e3   :  { %v776_v19 = vpack.c.bf16 %v775_v17, %v775_v17  ;;  %v1630_v21 = vpop.f32.mrb[23].mxu1 }
 0x7e5   :  { %1634 = vmatmul.mubr.msk.bf16.vlgmr.msra.gmra.mrb[24].mxu0 %vm179_vm3, %v776_v19 }
 0x7e6   :  { %1644 = vmatpush3.bf16.msra.mxu0 %v902_v22  ;;  %1645 = vmatprep.mubr.msk.bf16.mxu0 %vm1922_vm1, %v1921_v6 }
 0x7e7   :  { %1655 = vmatprep.subr.bf16.mxu0 %v1921_v6 }
 0x7e8   :  { %v879_v23 = vpop.f32.mrb[24].mxu1 }
 0x7e9   :  { %v885_v24 = vmul.f32 0.0625, %v879_v23  ;;  %v1641_v12 = vpop.f32.mrb[25].mxu1 }
 0x7ea   :  { %v882_v25 = vpop.f32.mrb[26].mxu1 }
 0x7eb   :  { %v1642_v26 = vpop.f32.mrb[27].mxu1  ;;  %v886_v27 = vadd.f32 %v885_v24, %v2062_v20 }
 0x7ed   :  { %v887_v28 = vsel %vm228_vm4, %v886_v27, -inf }
 0x7ee   :  { %888 = vmax.xlane.f32.xlu1 %v887_v28 }
 0x7f0   :  { %v990_v29 = vpop.f32.mrb[28].mxu1 }
 0x7f1   :  { %v996_v30 = vmul.f32 0.0625, %v990_v29  ;;  %v1653_v31 = vpop.f32.mrb[29].mxu1 }
 0x7f2   :  { %v993_v32 = vpop.f32.mrb[30].mxu1 }
 0x7f3   :  { %v1654_v33 = vpop.f32.mrb[31].mxu1  ;;  %v997_v34 = vadd.f32 %v996_v30, %v2062_v20 }
 0x7f5   :  { %v998_v35 = vsel %vm228_vm4, %v997_v34, -inf }
 0x7f6   :  { %999 = vmax.xlane.f32.xlu0 %v998_v35 }
 0x80c   :  { %1010 = vrot.lane.b32.xlu0 %v2173_v16, %s1923_s4 }
 0x810   :  { %1146 = vrot.lane.b32.xlu0 %v2128_v37, %s1925_s8 }
 0x87b   :  { %v889_v36 = vpop.xlane.xlu1 %888 }
 0x87c   :  { %v890_v39 = vsub.f32 %v886_v27, %v889_v36 }
 0x87e   :  { %v891_v40 = vmul.f32 1.442695, %v890_v39 }
 0x880   :  { %1755 = vpow2.f32 %v891_v40 }
 0x883   :  { %v1000_v41 = vpop.xlane.xlu0 %999 }
 0x884   :  { %v1001_v42 = vsub.f32 %v997_v34, %v1000_v41 }
 0x886   :  { %v1002_v43 = vmul.f32 1.442695, %v1001_v42 }
 0x887   :  { %v1011_v44 = vpop.permute.xlu0 %1010 }
 0x888   :  { %1757 = vpow2.f32 %v1002_v43  ;;  %v1016_v11 = vsel %vm243_vm2, %v1011_v44, 0 }
 0x88a   :  { %v1756_v10 = vpop.eup %1755 }
 0x88b   :  { %v897_v45 = vpack.c.bf16 %v1756_v10, %v1756_v10  ;;  %v1147_v17 = vpop.permute.xlu0 %1146 }
 0x88d   :  { %1646 = vmatmul.mubr.msk.bf16.vlgmr.msra.gmra.mrb[28].mxu0 %vm228_vm4, %v897_v45 }
 0x88e   :  { %1656 = vmatpush3.bf16.msra.mxu0 %v1016_v11  ;;  %1657 = vmatprep.mubr.msk.bf16.mxu0 %vm1922_vm1, %v1921_v6 }
 0x88f   :  { %1667 = vmatprep.subr.bf16.mxu0 %v1921_v6 }
 0x892   :  { %v1758_v46 = vpop.eup %1757 }
 0x893   :  { %v1004_v47 = vsel %vm228_vm4, %v1758_v46, 0.0  ;;  %v1008_v50 = vpack.c.bf16 %v1758_v46, %v1758_v46 }
 0x894   :  { %1005 = vadd.xlane.f32.xlu1 %v1004_v47 }
 0x895   :  { %1658 = vmatmul.mubr.msk.bf16.vlgmr.msra.gmra.mrb[32].mxu0 %vm228_vm4, %v1008_v50 }
 0x896   :  { %1668 = vmatpush3.bf16.msra.mxu0 %v2088_v48  ;;  %1669 = vmatprep.mubr.msk.bf16.mxu0 %vm1922_vm1, %v1921_v6  ;;  %v893_v48 = vsel %vm228_vm4, %v1756_v10, 0.0 }
 0x897   :  { %1679 = vmatprep.subr.bf16.mxu0 %v1921_v6 }
 0x8a5   :  { %1148 = vrot.lane.b32.xlu1 %v2128_v37, %s1926_s9 }
 0x8b8   :  { %v820_v52 = vpop.f32.mrb[24].mxu0 }
 0x8b9   :  { %v826_v53 = vadd.f32 %v820_v52, %v2165_v4  ;;  %v1635_v54 = vpop.f32.mrb[25].mxu0 }
 0x8ba   :  { %v823_v55 = vpop.f32.mrb[26].mxu0 }
 0x8bb   :  { %v833_v56 = vadd.f32 %v2202_v51, %v826_v53  ;;  %v1636_v57 = vpop.f32.mrb[27].mxu0 }
 0x8bd   :  { %1461 = vst.msk [vmem:[#allocation11] sm:$0xff] %vm127_vm0, %v833_v56 }
 0x8c9   :  { %894 = vadd.xlane.f32.xlu1 %v893_v48 }
 0x8da   :  { %1305 = vrot.lane.b32.xlu1 %v2128_v37, %s1927_s11 }
 0x8de   :  { %1303 = vrot.lane.b32.xlu1 %v2128_v37, %s1928_s12 }
 0x921   :  { %v1006_v58 = vpop.xlane.xlu1 %1005 }
 0x925   :  { %v1149_v59 = vpop.permute.xlu1 %1148 }
 0x926   :  { %v1154_v15 = vsel %vm179_vm3, %v1149_v59, 0 }
 0x956   :  { %v895_v60 = vpop.xlane.xlu1 %894 }
 0x957   :  { %1759 = vrcp.f32 %v895_v60 }
 0x958   :  { %1761 = vrcp.f32 %v1006_v58 }
 0x95a   :  { %v1306_v40 = vpop.permute.xlu1 %1305 }
 0x95b   :  { %v1311_v43 = vsel %vm179_vm3, %v1306_v40, 0 }
 0x95e   :  { %v1304_v10 = vpop.permute.xlu1 %1303 }
 0x960   :  { %v938_v61 = vpop.f32.mrb[28].mxu0 }
 0x961   :  { %v1760_v62 = vpop.eup %1759  ;;  %v1647_v63 = vpop.f32.mrb[29].mxu0 }
 0x962   :  { %v944_v0 = vmul.f32 %v1760_v62, %v938_v61  ;;  %v941_v1 = vpop.f32.mrb[30].mxu0  ;;  %v1762_v4 = vpop.eup %1761 }
 0x963   :  { %v1648_v2 = vpop.f32.mrb[31].mxu0 }
 0x964   :  { %v945_v3 = vpack.c.bf16 %v944_v0, %v944_v0 }
 0x966   :  { %1670 = vmatmul.mubr.msk.bf16.vlgmr.msra.gmra.mrb[36].mxu0 %vm179_vm3, %v945_v3 }
 0x967   :  { %1681 = vmatprep.mubr.msk.bf16.mxu0 %vm1922_vm1, %v1921_v6 }
 0x968   :  { %v1052_v5 = vpop.f32.mrb[32].mxu0 }
 0x969   :  { %v1058_v37 = vmul.f32 %v1762_v4, %v1052_v5  ;;  %v1659_v7 = vpop.f32.mrb[33].mxu0 }
 0x96a   :  { %v1055_v8 = vpop.f32.mrb[34].mxu0 }
 0x96b   :  { %v1059_v13 = vpack.c.bf16 %v1058_v37, %v1058_v37  ;;  %v1660_v49 = vpop.f32.mrb[35].mxu0 }
 0x96d   :  { %1664 = vmatmul.mubr.msk.bf16.vlgmr.msra.gmra.mrb[32].mxu1 %vm179_vm3, %v1059_v13 }
 0x96e   :  { %1674 = vmatpush3.bf16.xpose.msra.mxu1 %v1154_v15  ;;  %1675 = vmatprep.mubr.msk.bf16.mxu1 %vm1922_vm1, %v1921_v6 }
 0x96f   :  { %1685 = vmatprep.subr.bf16.mxu1 %v1921_v6 }
 0x975   :  { %1676 = vmatmul.mubr.msk.bf16.vlgmr.msra.gmra.mrb[36].mxu1 %vm179_vm3, %v1147_v17 }
 0x976   :  { %1686 = vmatpush3.bf16.msra.mxu1 %v2132_v38  ;;  %1687 = vmatprep.mubr.msk.bf16.mxu1 %vm1922_vm1, %v1921_v6 }
 0x977   :  { %1697 = vmatprep.subr.bf16.mxu1 %v1921_v6 }
 0xa39   :  { %v1140_v14 = vpop.f32.mrb[36].mxu0 }
 0xa3a   :  { %v1671_v18 = vpop.f32.mrb[37].mxu0 }
 0xa3b   :  { %v1143_v19 = vpop.f32.mrb[38].mxu0 }
 0xa3c   :  { %v1672_v21 = vpop.f32.mrb[39].mxu0 }
 0xa40   :  { %v1097_v22 = vpop.f32.mrb[32].mxu1 }
 0xa41   :  { %v2225_v23 = vadd.f32 %v1140_v14, %v1097_v22  ;;  %v1665_v24 = vpop.f32.mrb[33].mxu1 }
 0xa42   :  { %v1100_v12 = vpop.f32.mrb[34].mxu1 }
 0xa43   :  { %v1666_v25 = vpop.f32.mrb[35].mxu1 }
 0xa48   :  { %v1190_v26 = vpop.f32.mrb[36].mxu1 }
 0xa49   :  { %v1196_v27 = vmul.f32 0.0625, %v1190_v26  ;;  %v1677_v28 = vpop.f32.mrb[37].mxu1 }
 0xa4a   :  { %v1193_v29 = vpop.f32.mrb[38].mxu1 }
 0xa4b   :  { %v1678_v38 = vpop.f32.mrb[39].mxu1  ;;  %v1197_v30 = vadd.f32 %v1196_v27, %v2062_v20 }
 0xa4d   :  { %v1198_v31 = vsel %vm228_vm4, %v1197_v30, -inf }
 0xa4e   :  { %1199 = vmax.xlane.f32.xlu0 %v1198_v31 }
 0xa64   :  { %1209 = vrot.lane.b32.xlu0 %v2173_v16, %s1925_s8 }
 0xadb   :  { %v1200_v32 = vpop.xlane.xlu0 %1199 }
 0xadc   :  { %v1201_v33 = vsub.f32 %v1197_v30, %v1200_v32 }
 0xade   :  { %v1202_v34 = vmul.f32 1.442695, %v1201_v33 }
 0xadf   :  { %v1210_v35 = vpop.permute.xlu0 %1209 }
 0xae0   :  { %1763 = vpow2.f32 %v1202_v34  ;;  %v1215_v36 = vsel %vm243_vm2, %v1210_v35, 0 }
 0xae1   :  { %1680 = vmatpush3.bf16.msra.mxu0 %v1215_v36 }
 0xae2   :  { %1691 = vmatprep.subr.bf16.mxu0 %v1921_v6 }
 0xaea   :  { %v1764_v39 = vpop.eup %1763 }
 0xaeb   :  { %v1204_v41 = vsel %vm228_vm4, %v1764_v39, 0.0  ;;  %v1208_v42 = vpack.c.bf16 %v1764_v39, %v1764_v39 }
 0xaec   :  { %1205 = vadd.xlane.f32.xlu0 %v1204_v41 }
 0xaed   :  { %1682 = vmatmul.mubr.msk.bf16.vlgmr.msra.gmra.mrb[40].mxu0 %vm228_vm4, %v1208_v42 }
 0xaee   :  { %1692 = vmatpush3.bf16.xpose.msra.mxu0 %v1311_v43  ;;  %1693 = vmatprep.mubr.msk.bf16.mxu0 %vm1922_vm1, %v1921_v6 }
 0xaef   :  { %1703 = vmatprep.subr.bf16.mxu0 %v1921_v6 }
 0xaf5   :  { %1694 = vmatmul.mubr.msk.bf16.vlgmr.msra.gmra.mrb[44].mxu0 %vm179_vm3, %v1304_v10 }
 0xaf6   :  { %1704 = vmatpush3.bf16.msra.mxu0 %v2167_v9  ;;  %1705 = vmatprep.mubr.msk.bf16.mxu0 %vm1922_vm1, %v1921_v6 }
 0xb02   :  { %1366 = vrot.lane.b32.xlu0 %v2173_v16, %s1928_s12 }
 0xb79   :  { %v1206_v44 = vpop.xlane.xlu0 %1205 }
 0xb7a   :  { %1765 = vrcp.f32 %v1206_v44 }
 0xb7d   :  { %v1367_v50 = vpop.permute.xlu0 %1366 }
 0xb7e   :  { %v1372_v55 = vsel %vm243_vm2, %v1367_v50, 0 }
 0xb84   :  { %v1766_v45 = vpop.eup %1765 }
 0xbc0   :  { %v1251_v11 = vpop.f32.mrb[40].mxu0 }
 0xbc1   :  { %v1257_v46 = vmul.f32 %v1766_v45, %v1251_v11  ;;  %v1683_v47 = vpop.f32.mrb[41].mxu0 }
 0xbc2   :  { %v1254_v52 = vpop.f32.mrb[42].mxu0 }
 0xbc3   :  { %v1258_v53 = vpack.c.bf16 %v1257_v46, %v1257_v46  ;;  %v1684_v54 = vpop.f32.mrb[43].mxu0 }
 0xbc5   :  { %1688 = vmatmul.mubr.msk.bf16.vlgmr.msra.gmra.mrb[40].mxu1 %vm179_vm3, %v1258_v53 }
 0xbc6   :  { %1698 = vmatpush3.bf16.msra.mxu1 %v1372_v55  ;;  %1699 = vmatprep.mubr.msk.bf16.mxu1 %vm1922_vm1, %v1921_v6 }
 0xbc8   :  { %v1347_v9 = vpop.f32.mrb[44].mxu0 }
 0xbc9   :  { %v1353_v16 = vmul.f32 0.0625, %v1347_v9  ;;  %v1695_v56 = vpop.f32.mrb[45].mxu0 }
 0xbca   :  { %v1350_v57 = vpop.f32.mrb[46].mxu0 }
 0xbcb   :  { %v1696_v48 = vpop.f32.mrb[47].mxu0  ;;  %v1354_v58 = vadd.f32 %v1353_v16, %v2062_v20 }
 0xbcd   :  { %v1355_v59 = vsel %vm228_vm4, %v1354_v58, -inf }
 0xbce   :  { %1356 = vmax.xlane.f32.xlu1 %v1355_v59 }
 0xc5b   :  { %v1357_v60 = vpop.xlane.xlu1 %1356 }
 0xc5c   :  { %v1358_v61 = vsub.f32 %v1354_v58, %v1357_v60 }
 0xc5e   :  { %v1359_v62 = vmul.f32 1.442695, %v1358_v61 }
 0xc60   :  { %1767 = vpow2.f32 %v1359_v62 }
 0xc6a   :  { %v1768_v63 = vpop.eup %1767 }
 0xc6b   :  { %v1361_v0 = vsel %vm228_vm4, %v1768_v63, 0.0  ;;  %v1365_v1 = vpack.c.bf16 %v1768_v63, %v1768_v63 }
 0xc6c   :  { %1362 = vadd.xlane.f32.xlu1 %v1361_v0 }
 0xc6d   :  { %1700 = vmatmul.mubr.msk.bf16.vlgmr.msra.gmra.mrb[44].mxu1 %vm228_vm4, %v1365_v1 }
 0xc98   :  { %v1296_v6 = vpop.f32.mrb[40].mxu1 }
 0xc99   :  { %v1302_v2 = vadd.f32 %v1296_v6, %v2225_v23  ;;  %v1689_v3 = vpop.f32.mrb[41].mxu1 }
 0xc9a   :  { %v1299_v4 = vpop.f32.mrb[42].mxu1 }
 0xc9b   :  { %v1690_v20 = vpop.f32.mrb[43].mxu1 }
 0xcf9   :  { %v1363_v5 = vpop.xlane.xlu1 %1362 }
 0xcfa   :  { %1769 = vrcp.f32 %v1363_v5 }
 0xd04   :  { %v1770_v37 = vpop.eup %1769 }
 0xd40   :  { %v1408_v7 = vpop.f32.mrb[44].mxu1 }
 0xd41   :  { %v1414_v8 = vmul.f32 %v1770_v37, %v1408_v7  ;;  %v1701_v13 = vpop.f32.mrb[45].mxu1 }
 0xd42   :  { %v1411_v49 = vpop.f32.mrb[46].mxu1 }
 0xd43   :  { %v1415_v15 = vpack.c.bf16 %v1414_v8, %v1414_v8  ;;  %v1702_v17 = vpop.f32.mrb[47].mxu1 }
 0xd45   :  { %1706 = vmatmul.mubr.msk.bf16.vlgmr.msra.gmra.mrb[48].mxu0 %vm179_vm3, %v1415_v15 }
 0xe18   :  { %v1453_v14 = vpop.f32.mrb[48].mxu0 }
 0xe19   :  { %v1459_v18 = vadd.f32 %v1453_v14, %v1302_v2  ;;  %v1707_v19 = vpop.f32.mrb[49].mxu0 }
 0xe1a   :  { %v1456_v21 = vpop.f32.mrb[50].mxu0 }
 0xe1b   :  { %v1460_v22 = vadd.f32 %v2202_v51, %v1459_v18  ;;  %v1708_v23 = vpop.f32.mrb[51].mxu0 }
 0xe1d   :  { %1462 = vst.msk [vmem:[#allocation11 + $0x8] sm:$0xff] %vm127_vm0, %v1460_v22 }
 0xe1e   :  { %1892 = shalt.err (!%p1889_p2)
}
 0xe1f   :  { %s1893_s17 = scalar_lea.hbm %s2277_s5, 256 }
 0xe20   :  { %p1894_p3 = scmp.ne.s32.totalorder %s2277_s5, %s1893_s17  ;;  %p1897_p4 = scmp.lt.u32.totalorder %s1893_s17, %s2277_s5 }
 0xe22   :  { %p1899_p5 = pnand %p1897_p4, %p1894_p3 }
 0xe24   :  { %1902 = shalt.err (!%p1899_p5)
}
 0xe25   :  { %1474 = dma.vmem_to_hbm [thread:$0]  %s1469_s13, 256, %s2277_s5, [#allocation4], %s1912_s28, %s1912_s28, %s1913_s29  }
 0xe26   :  { %1909 = dma.done.wait [#allocation4], 256  }
 0xe27   :  { %1910 = vsyncadd [#allocation4], 4294967040 }
 0xe28   :  { %1478 = vsyncpa [#allocation3], 1 }
 0xe29   :  { %1479 = vsyncpa [#allocation6], 1 }
 0xe2a   :  { %1480 = vsyncpa [#allocation9], 1 }
 0xe2b   :  { %1481 = vsyncpa [#allocation4], 1 }

</bundles_post_ra>
